<compile_context>
chip_gen: v7x
topology: tpu7x:2x2x1
jax: 0.10.0
libtpu: 0.0.40
codegen_flags: <defaults>
</compile_context>

<pallas_src>
import functools

import jax
import jax.numpy as jnp
from jax.experimental import pallas as pl
from jax.experimental.pallas import tpu as pltpu

_VMEM_LIMIT = 48 * 1024 * 1024  # > v5e 16 MiB scoped default, < v7x 64 MiB physical


# ----------------------------------------------------------------------------
# helpers
# ----------------------------------------------------------------------------
def _ceil_mult(x, m):
    return ((x + m - 1) // m) * m


def _pad2(a, rows, cols):
    r, c = a.shape
    if r == rows and c == cols:
        return a
    return jnp.pad(a, ((0, rows - r), (0, cols - c)))


def _split_leading_tile(mp, tm, align):
    """v7x has 2 TensorCores sharded over 'parallel' grid axes; if the leading
    axis would have a single program, halve the tile so both cores get work."""
    if mp // tm < 2 and tm % (2 * align) == 0:
        return tm // 2
    return tm


# ----------------------------------------------------------------------------
# Kernel 1: tiled bf16 matmul   y = x @ w   (f32 VMEM accumulator, bf16 output)
#   grid = (M/tm, N/tn, K/tk)   K-axis is the reduction -> accumulator scratch
# ----------------------------------------------------------------------------
def _matmul_kernel(x_ref, w_ref, o_ref, acc_ref):
    k = pl.program_id(2)

    @pl.when(k == 0)
    def _init():
        acc_ref[...] = jnp.zeros_like(acc_ref)

    acc_ref[...] += jnp.dot(x_ref[...], w_ref[...], preferred_element_type=jnp.float32)

    @pl.when(k == pl.num_programs(2) - 1)
    def _fin():
        o_ref[...] = acc_ref[...].astype(o_ref.dtype)


def matmul_bf16(x, w, *, tm_max=512, tn_max=512, tk_max=512):
    """x:(M,K) bf16, w:(K,N) bf16 -> (M,N) bf16."""
    M, K = x.shape
    K2, N = w.shape
    assert K == K2

    tm = min(tm_max, _ceil_mult(M, 8))
    tk = min(tk_max, _ceil_mult(K, 128))
    tn = min(tn_max, _ceil_mult(N, 128))
    Mp, Kp, Np = _ceil_mult(M, tm), _ceil_mult(K, tk), _ceil_mult(N, tn)
    tm = _split_leading_tile(Mp, tm, align=16)   # bf16 sublane packing -> keep multiple of 16

    xp = _pad2(x, Mp, Kp)
    wp = _pad2(w, Kp, Np)

    out = pl.pallas_call(
        _matmul_kernel,
        out_shape=jax.ShapeDtypeStruct((Mp, Np), jnp.bfloat16),
        grid=(Mp // tm, Np // tn, Kp // tk),
        in_specs=[
            pl.BlockSpec((tm, tk), lambda i, j, k: (i, k)),
            pl.BlockSpec((tk, tn), lambda i, j, k: (k, j)),
        ],
        out_specs=pl.BlockSpec((tm, tn), lambda i, j, k: (i, j)),
        scratch_shapes=[pltpu.VMEM((tm, tn), jnp.float32)],
        compiler_params=pltpu.CompilerParams(
            dimension_semantics=("parallel", "parallel", "arbitrary"),
            vmem_limit_bytes=_VMEM_LIMIT,
        ),
    )(xp, wp)
    return out[:M, :N]


# ----------------------------------------------------------------------------
# Kernel 2: SAGE 'mean' aggregation + combine + activation (degree fused in)
#   proj = [h @ W_self | h @ W_neigh]   (N, 2H) bf16, lane-dense
#   out[i] = act( (sum_k adj[i,k] * proj_neigh[k]) / max(deg[i],1) + proj_self[i] + b )
#   grid = (dst tiles, src tiles)  -> src axis is the reduction
# ----------------------------------------------------------------------------
def _sage_agg_kernel(adj_ref, pn_ref, ps_ref, b_ref, o_ref, acc_ref, deg_ref,
                     *, act, resident, tk):
    k = pl.program_id(1)

    @pl.when(k == 0)
    def _init():
        acc_ref[...] = jnp.zeros_like(acc_ref)
        deg_ref[...] = jnp.zeros_like(deg_ref)

    adj_f = adj_ref[...].astype(jnp.float32)          # int8 0/1 -> exact in f32/bf16
    if resident:
        # pn_ref is the full (Np, H) neigh projection resident in VMEM; slice the
        # rows belonging to this reduction step.
        off = pl.multiple_of(k * tk, tk)
        pn = pn_ref[pl.ds(off, tk), :]
    else:
        pn = pn_ref[...]

    acc_ref[...] += jnp.dot(adj_f.astype(jnp.bfloat16), pn,
                            preferred_element_type=jnp.float32)
    deg_ref[...] += jnp.sum(adj_f, axis=1, keepdims=True)    # XLU row-sum, free under MXU

    @pl.when(k == pl.num_programs(1) - 1)
    def _fin():
        inv = pl.reciprocal(jnp.maximum(deg_ref[...], 1.0), approx=True)  # EUP slot
        r = acc_ref[...] * inv + ps_ref[...].astype(jnp.float32) + b_ref[...]
        if act == "relu":
            r = jnp.maximum(r, 0.0)
        o_ref[...] = r.astype(o_ref.dtype)


def sage_aggregate(adj, proj, bias, act=None, *, tm_max=512):
    """adj:(N,N) int8, proj:(N,2H) bf16 laid out as [self | neigh], bias:(1,H) f32."""
    N = adj.shape[0]
    H2 = proj.shape[1]
    H = H2 // 2
    assert H % 128 == 0, "hid_size must be a multiple of 128 for this kernel"
    # The neigh-half BlockSpec uses column-block index 1 with block width == H, which
    # addresses columns [H:2H] only because proj's width is exactly 2*H.
    assert H2 == 2 * H

    # Pad the node axis so a 512-wide reduction tile is available at large N.
    Np = _ceil_mult(N, 512) if N > 256 else _ceil_mult(N, 128)
    tk = 512 if Np % 512 == 0 else (256 if Np % 256 == 0 else 128)
    tm = min(tm_max, Np)
    tm = _split_leading_tile(Np, tm, align=32)   # int8 adjacency -> keep multiple of 32

    adj_p = _pad2(adj, Np, Np)                   # int8, padded rows/cols are 0
    proj_p = _pad2(proj, Np, H2)
    bias = bias.reshape(1, H).astype(jnp.float32)

    # Keep the whole neigh projection resident in VMEM when it is small enough so it
    # is read from HBM exactly once (instead of once per dst tile).
    resident = (Np * H * 2) <= 8 * 1024 * 1024
    if resident:
        pn_spec = pl.BlockSpec((Np, H), lambda i, k: (0, 1))   # grid-invariant block
    else:
        pn_spec = pl.BlockSpec((tk, H), lambda i, k: (k, 1))   # stream per src tile

    out = pl.pallas_call(
        functools.partial(_sage_agg_kernel, act=act, resident=resident, tk=tk),
        out_shape=jax.ShapeDtypeStruct((Np, H), jnp.bfloat16),
        grid=(Np // tm, Np // tk),
        in_specs=[
            pl.BlockSpec((tm, tk), lambda i, k: (i, k)),   # adjacency tile (dst, src), int8
            pn_spec,                                       # neigh half of proj (src rows)
            pl.BlockSpec((tm, H), lambda i, k: (i, 0)),    # self half of proj (dst rows)
            pl.BlockSpec((1, H), lambda i, k: (0, 0)),     # bias
        ],
        out_specs=pl.BlockSpec((tm, H), lambda i, k: (i, 0)),
        scratch_shapes=[
            pltpu.VMEM((tm, H), jnp.float32),   # f32 accumulator
            pltpu.VMEM((tm, 1), jnp.float32),   # in-degree accumulator
        ],
        compiler_params=pltpu.CompilerParams(
            dimension_semantics=("parallel", "arbitrary"),
            vmem_limit_bytes=_VMEM_LIMIT,
        ),
    )(adj_p, proj_p, proj_p, bias)
    return out[:N]


# ----------------------------------------------------------------------------
# Kernel 3: fused edge-score predictor (pos + neg batches concatenated)
#   out = Linear3( ReLU( Linear2( ReLU( Linear1( h_src * h_dst ) ) ) ) )
#   final Linear(hid, 1) is a VPU multiply + lane-reduce (no 1-column matmul)
# ----------------------------------------------------------------------------
def _predictor_kernel(hs_ref, hd_ref, w1_ref, b1_ref, w2_ref, b2_ref, w3_ref, b3_ref, o_ref):
    x = hs_ref[...] * hd_ref[...]                                   # bf16 elementwise
    x = jnp.maximum(
        jnp.dot(x, w1_ref[...], preferred_element_type=jnp.float32) + b1_ref[...], 0.0)
    x = jnp.maximum(
        jnp.dot(x.astype(jnp.bfloat16), w2_ref[...],
                preferred_element_type=jnp.float32) + b2_ref[...], 0.0)
    o_ref[...] = (jnp.sum(x * w3_ref[...], axis=-1, keepdims=True)
                  + b3_ref[...]).astype(o_ref.dtype)


def predictor(h_src, h_dst, p):
    E, H = h_src.shape
    Hh = p["w1"].shape[1]
    assert H % 128 == 0 and Hh % 128 == 0

    tm = min(256, _ceil_mult(E, 8))
    Ep = _ceil_mult(E, tm)
    tm = _split_leading_tile(Ep, tm, align=16)
    hs = _pad2(h_src, Ep, H)
    hd = _pad2(h_dst, Ep, H)

    out = pl.pallas_call(
        _predictor_kernel,
        out_shape=jax.ShapeDtypeStruct((Ep, 1), jnp.float32),
        grid=(Ep // tm,),
        in_specs=[
            pl.BlockSpec((tm, H), lambda i: (i, 0)),
            pl.BlockSpec((tm, H), lambda i: (i, 0)),
            pl.BlockSpec((H, Hh), lambda i: (0, 0)),
            pl.BlockSpec((1, Hh), lambda i: (0, 0)),
            pl.BlockSpec((Hh, Hh), lambda i: (0, 0)),
            pl.BlockSpec((1, Hh), lambda i: (0, 0)),
            pl.BlockSpec((1, Hh), lambda i: (0, 0)),   # w3 stored as a row vector
            pl.BlockSpec((1, 1), lambda i: (0, 0)),
        ],
        out_specs=pl.BlockSpec((tm, 1), lambda i: (i, 0)),
        compiler_params=pltpu.CompilerParams(
            dimension_semantics=("parallel",),
            vmem_limit_bytes=_VMEM_LIMIT,
        ),
    )(hs, hd, p["w1"], p["b1"], p["w2"], p["b2"], p["w3_row"], p["b3"])
    return out[:E]


# ----------------------------------------------------------------------------
# Model glue (plain JAX): parameters, edge gathers
# ----------------------------------------------------------------------------
def init_params(key, in_size, hid_size, num_layers):
    params = {"layers": [], "pred": {}}
    d_in = in_size
    for _ in range(num_layers):
        key, k1, k2, k3 = jax.random.split(key, 4)
        w_self = jax.random.normal(k1, (d_in, hid_size), jnp.float32) / jnp.sqrt(d_in)
        w_neigh = jax.random.normal(k2, (d_in, hid_size), jnp.float32) / jnp.sqrt(d_in)
        params["layers"].append({
            # (d_in, 2H): [self | neigh], stored bf16 (MXU operand; no in-kernel cast)
            "w_cat": jnp.concatenate([w_self, w_neigh], axis=1).astype(jnp.bfloat16),
            "b_self": jax.random.normal(k3, (1, hid_size), jnp.float32) * 0.01,
        })
        d_in = hid_size
    key, k1, k2, k3, k4, k5, k6 = jax.random.split(key, 7)
    H = hid_size
    params["pred"] = {
        "w1": (jax.random.normal(k1, (H, H), jnp.float32) / jnp.sqrt(H)).astype(jnp.bfloat16),
        "b1": jax.random.normal(k2, (1, H), jnp.float32) * 0.01,
        "w2": (jax.random.normal(k3, (H, H), jnp.float32) / jnp.sqrt(H)).astype(jnp.bfloat16),
        "b2": jax.random.normal(k4, (1, H), jnp.float32) * 0.01,
        "w3_row": jax.random.normal(k5, (1, H), jnp.float32) / jnp.sqrt(H),
        "b3": jax.random.normal(k6, (1, 1), jnp.float32) * 0.01,
    }
    return params


def sage_forward(params, adj_blocks, x, pos_src, pos_dst, neg_src, neg_dst):
    h = x.astype(jnp.bfloat16)                                   # bf16 activations in HBM
    nl = len(params["layers"])
    for l, lp in enumerate(params["layers"]):
        proj = matmul_bf16(h, lp["w_cat"])                       # (N, 2H) bf16, lane-dense
        act = "relu" if l != nl - 1 else None
        h = sage_aggregate(adj_blocks[l], proj, lp["b_self"], act=act)   # (N, H) bf16

    n_pos = pos_src.shape[0]
    src = jnp.concatenate([pos_src, neg_src])
    dst = jnp.concatenate([pos_dst, neg_dst])
    hs = jnp.take(h, src, axis=0)
    hd = jnp.take(h, dst, axis=0)
    scores = predictor(hs, hd, params["pred"])                   # (n_pos + n_neg, 1) f32
    return scores[:n_pos], scores[n_pos:]


def sage_forward_ref(params, adj_blocks, x, pos_src, pos_dst, neg_src, neg_dst):
    """Pure-JAX f32 reference (uses the same bf16-quantized weights / inputs, upcast)."""
    h = x.astype(jnp.float32)
    nl = len(params["layers"])
    for l, lp in enumerate(params["layers"]):
        adj = adj_blocks[l].astype(jnp.float32)
        H = lp["b_self"].shape[1]
        w_cat = lp["w_cat"].astype(jnp.float32)
        w_self, w_neigh = w_cat[:, :H], w_cat[:, H:]
        deg = jnp.maximum(adj.sum(1, keepdims=True), 1.0)
        h_neigh = (adj @ h) / deg
        h = h @ w_self + lp["b_self"] + h_neigh @ w_neigh
        if l != nl - 1:
            h = jnp.maximum(h, 0.0)

    def pred(z):
        p = params["pred"]
        z = jnp.maximum(z @ p["w1"].astype(jnp.float32) + p["b1"], 0.0)
        z = jnp.maximum(z @ p["w2"].astype(jnp.float32) + p["b2"], 0.0)
        return z @ p["w3_row"].T + p["b3"]

    return pred(h[pos_src] * h[pos_dst]), pred(h[neg_src] * h[neg_dst])


if __name__ == "__main__":
    # small, deterministic problem (sizes chosen to be TPU-tile friendly)
    N = 128            # nodes (same node set per block)
    in_size = 128
    hid_size = 128
    num_layers = 3     # SAGE default
    E = 64             # pos / neg edges

    key = jax.random.PRNGKey(0)
    key, kp, kx, ka, ke = jax.random.split(key, 5)

    params = init_params(kp, in_size, hid_size, num_layers)
    x = jax.random.normal(kx, (N, in_size), jnp.float32).astype(jnp.bfloat16)

    # dense adjacency masks per block (adj[i, j] = 1  <=>  edge j -> i), plus self-loops,
    # stored int8 (0/1 exact) so the dominant HBM stream is 4x smaller than f32
    eye = jnp.eye(N, dtype=jnp.bool_)
    adj_blocks = [
        (jax.random.bernoulli(k, 0.1, (N, N)) | eye).astype(jnp.int8)
        for k in jax.random.split(ka, num_layers)
    ]

    ke1, ke2, ke3, ke4 = jax.random.split(ke, 4)
    pos_src = jax.random.randint(ke1, (E,), 0, N)
    pos_dst = jax.random.randint(ke2, (E,), 0, N)
    neg_src = jax.random.randint(ke3, (E,), 0, N)
    neg_dst = jax.random.randint(ke4, (E,), 0, N)

    fwd = jax.jit(sage_forward)
    h_pos, h_neg = fwd(params, adj_blocks, x, pos_src, pos_dst, neg_src, neg_dst)
    jax.block_until_ready((h_pos, h_neg))

    # pure-JAX reference check (bf16 MXU inputs + bf16 intermediates -> loose tolerance)
    r_pos, r_neg = sage_forward_ref(params, adj_blocks, x, pos_src, pos_dst, neg_src, neg_dst)
    scale = float(jnp.maximum(jnp.max(jnp.abs(r_pos)), jnp.max(jnp.abs(r_neg)))) + 1.0
    err = float(jnp.maximum(jnp.max(jnp.abs(h_pos - r_pos)),
                            jnp.max(jnp.abs(h_neg - r_neg)))) / scale

    assert h_pos.shape == (E, 1) and h_neg.shape == (E, 1)
    assert bool(jnp.all(jnp.isfinite(h_pos))) and bool(jnp.all(jnp.isfinite(h_neg)))
    assert err < 5e-2, f"mismatch vs reference: relative error {err}"
    print("KERNEL_OK")
</pallas_src>

<mosaic_0001>
module attributes {stable_mosaic.version = 11 : i64} {
  func.func @_matmul_kernel(%arg0: i32, %arg1: i32, %arg2: i32, %arg3: memref<64x128xbf16, #tpu.memory_space<vmem>>, %arg4: memref<128x256xbf16, #tpu.memory_space<vmem>>, %arg5: memref<64x256xbf16, #tpu.memory_space<vmem>>, %arg6: memref<64x256xf32, #tpu.memory_space<vmem>>) attributes {dimension_semantics = [#tpu.dimension_semantics<parallel>, #tpu.dimension_semantics<parallel>, #tpu.dimension_semantics<arbitrary>], iteration_bounds = array<i64: 2, 1, 1>, scalar_prefetch = 0 : i64, scratch_operands = 1 : i64, tpu.core_type = #tpu.core_type<tc>, window_params = [{transform_indices = @transform_0, window_bounds = array<i64: 64, 128>}, {transform_indices = @transform_1, window_bounds = array<i64: 128, 256>}, {transform_indices = @transform_2, window_bounds = array<i64: 64, 256>}]} {
    %c0_i32 = arith.constant 0 : i32
    %0 = arith.cmpi eq, %arg2, %c0_i32 : i32
    %1 = arith.extui %0 : i1 to i32
    %c0_i32_0 = arith.constant 0 : i32
    %2 = arith.cmpi ne, %1, %c0_i32_0 : i32
    scf.if %2 {
      %cst_10 = arith.constant 0.000000e+00 : f32
      %12 = vector.broadcast %cst_10 : f32 to vector<64x256xf32>
      %c0_11 = arith.constant 0 : index
      %c0_12 = arith.constant 0 : index
      %13 = vector.load %arg6[%c0_11, %c0_12] : memref<64x256xf32, #tpu.memory_space<vmem>>, vector<64x256xf32>
      tpu.vector_store %arg6[%c0_11, %c0_12], %12 {strides = array<i32>} : memref<64x256xf32, #tpu.memory_space<vmem>>, vector<64x256xf32>,
    } else {
    }
    %c0 = arith.constant 0 : index
    %c0_1 = arith.constant 0 : index
    %3 = vector.load %arg6[%c0, %c0_1] : memref<64x256xf32, #tpu.memory_space<vmem>>, vector<64x256xf32>
    %c0_2 = arith.constant 0 : index
    %c0_3 = arith.constant 0 : index
    %4 = vector.load %arg3[%c0_2, %c0_3] : memref<64x128xbf16, #tpu.memory_space<vmem>>, vector<64x128xbf16>
    %c0_4 = arith.constant 0 : index
    %c0_5 = arith.constant 0 : index
    %5 = vector.load %arg4[%c0_4, %c0_5] : memref<128x256xbf16, #tpu.memory_space<vmem>>, vector<128x256xbf16>
    %cst = arith.constant dense<0.000000e+00> : vector<64x256xf32>
    %6 = tpu.matmul %4, %5, %cst {dimension_numbers = #tpu.dot_dimension_numbers<[1], [0], [0], [1], [0, 0, 1, 1], [], []>} : vector<64x128xbf16>, vector<128x256xbf16>, vector<64x256xf32> -> vector<64x256xf32>
    %7 = arith.addf %3, %6 : vector<64x256xf32>
    %c0_6 = arith.constant 0 : index
    %c0_7 = arith.constant 0 : index
    %8 = vector.load %arg6[%c0_6, %c0_7] : memref<64x256xf32, #tpu.memory_space<vmem>>, vector<64x256xf32>
    tpu.vector_store %arg6[%c0_6, %c0_7], %7 {strides = array<i32>} : memref<64x256xf32, #tpu.memory_space<vmem>>, vector<64x256xf32>,
    %c0_i32_8 = arith.constant 0 : i32
    %9 = arith.cmpi eq, %arg2, %c0_i32_8 : i32
    %10 = arith.extui %9 : i1 to i32
    %c0_i32_9 = arith.constant 0 : i32
    %11 = arith.cmpi ne, %10, %c0_i32_9 : i32
    scf.if %11 {
      %c0_10 = arith.constant 0 : index
      %c0_11 = arith.constant 0 : index
      %12 = vector.load %arg6[%c0_10, %c0_11] : memref<64x256xf32, #tpu.memory_space<vmem>>, vector<64x256xf32>
      %13 = arith.truncf %12 : vector<64x256xf32> to vector<64x256xbf16>
      %c0_12 = arith.constant 0 : index
      %c0_13 = arith.constant 0 : index
      %14 = vector.load %arg5[%c0_12, %c0_13] : memref<64x256xbf16, #tpu.memory_space<vmem>>, vector<64x256xbf16>
      tpu.vector_store %arg5[%c0_12, %c0_13], %13 {strides = array<i32>} : memref<64x256xbf16, #tpu.memory_space<vmem>>, vector<64x256xbf16>,
    } else {
    }
    return
  }
  func.func @transform_0(%arg0: i32, %arg1: i32, %arg2: i32) -> (i32, i32) {
    %c0_i32 = arith.constant 0 : i32
    return %arg0, %arg2 : i32, i32
  }
  func.func @transform_1(%arg0: i32, %arg1: i32, %arg2: i32) -> (i32, i32) {
    %c0_i32 = arith.constant 0 : i32
    return %arg2, %arg1 : i32, i32
  }
  func.func @transform_2(%arg0: i32, %arg1: i32, %arg2: i32) -> (i32, i32) {
    %c0_i32 = arith.constant 0 : i32
    return %arg0, %arg1 : i32, i32
  }
}

module attributes {stable_mosaic.version = 11 : i64} {
  func.func @_sage_agg_kernel(%arg0: i32, %arg1: i32, %arg2: memref<64x128xi8, #tpu.memory_space<vmem>>, %arg3: memref<128x128xbf16, #tpu.memory_space<vmem>>, %arg4: memref<64x128xbf16, #tpu.memory_space<vmem>>, %arg5: memref<1x128xf32, #tpu.memory_space<vmem>>, %arg6: memref<64x128xbf16, #tpu.memory_space<vmem>>, %arg7: memref<64x128xf32, #tpu.memory_space<vmem>>, %arg8: memref<64x1xf32, #tpu.memory_space<vmem>>) attributes {dimension_semantics = [#tpu.dimension_semantics<parallel>, #tpu.dimension_semantics<arbitrary>], iteration_bounds = array<i64: 2, 1>, scalar_prefetch = 0 : i64, scratch_operands = 2 : i64, tpu.core_type = #tpu.core_type<tc>, window_params = [{transform_indices = @transform_0, window_bounds = array<i64: 64, 128>}, {transform_indices = @transform_1, window_bounds = array<i64: 128, 128>}, {transform_indices = @transform_2, window_bounds = array<i64: 64, 128>}, {pipeline_mode = #tpu.pipeline_mode<synchronous>, transform_indices = @transform_3, window_bounds = array<i64: 1, 128>}, {transform_indices = @transform_4, window_bounds = array<i64: 64, 128>}]} {
    %c0_i32 = arith.constant 0 : i32
    %0 = arith.cmpi eq, %arg1, %c0_i32 : i32
    %1 = arith.extui %0 : i1 to i32
    %c0_i32_0 = arith.constant 0 : i32
    %2 = arith.cmpi ne, %1, %c0_i32_0 : i32
    scf.if %2 {
      %cst_14 = arith.constant 0.000000e+00 : f32
      %22 = vector.broadcast %cst_14 : f32 to vector<64x128xf32>
      %c0_15 = arith.constant 0 : index
      %c0_16 = arith.constant 0 : index
      %23 = vector.load %arg7[%c0_15, %c0_16] : memref<64x128xf32, #tpu.memory_space<vmem>>, vector<64x128xf32>
      tpu.vector_store %arg7[%c0_15, %c0_16], %22 {strides = array<i32>} : memref<64x128xf32, #tpu.memory_space<vmem>>, vector<64x128xf32>,
      %cst_17 = arith.constant 0.000000e+00 : f32
      %24 = vector.broadcast %cst_17 : f32 to vector<64x1xf32>
      %c0_18 = arith.constant 0 : index
      %c0_19 = arith.constant 0 : index
      %25 = vector.load %arg8[%c0_18, %c0_19] : memref<64x1xf32, #tpu.memory_space<vmem>>, vector<64x1xf32>
      tpu.vector_store %arg8[%c0_18, %c0_19], %24 {strides = array<i32>} : memref<64x1xf32, #tpu.memory_space<vmem>>, vector<64x1xf32>,
    } else {
    }
    %c0 = arith.constant 0 : index
    %c0_1 = arith.constant 0 : index
    %3 = vector.load %arg2[%c0, %c0_1] : memref<64x128xi8, #tpu.memory_space<vmem>>, vector<64x128xi8>
    %4 = arith.sitofp %3 : vector<64x128xi8> to vector<64x128xf32>
    %c128_i32 = arith.constant 128 : i32
    %5 = arith.muli %arg1, %c128_i32 : i32
    %6 = tpu.assume_multiple %5, 128 : i32
    %7 = arith.index_cast %6 : i32 to index
    %c0_2 = arith.constant 0 : index
    %8 = vector.load %arg3[%7, %c0_2] : memref<128x128xbf16, #tpu.memory_space<vmem>>, vector<128x128xbf16>
    %c0_3 = arith.constant 0 : index
    %c0_4 = arith.constant 0 : index
    %9 = vector.load %arg7[%c0_3, %c0_4] : memref<64x128xf32, #tpu.memory_space<vmem>>, vector<64x128xf32>
    %10 = arith.truncf %4 : vector<64x128xf32> to vector<64x128xbf16>
    %cst = arith.constant dense<0.000000e+00> : vector<64x128xf32>
    %11 = tpu.matmul %10, %8, %cst {dimension_numbers = #tpu.dot_dimension_numbers<[1], [0], [0], [1], [0, 0, 1, 1], [], []>} : vector<64x128xbf16>, vector<128x128xbf16>, vector<64x128xf32> -> vector<64x128xf32>
    %12 = arith.addf %9, %11 : vector<64x128xf32>
    %c0_5 = arith.constant 0 : index
    %c0_6 = arith.constant 0 : index
    %13 = vector.load %arg7[%c0_5, %c0_6] : memref<64x128xf32, #tpu.memory_space<vmem>>, vector<64x128xf32>
    tpu.vector_store %arg7[%c0_5, %c0_6], %12 {strides = array<i32>} : memref<64x128xf32, #tpu.memory_space<vmem>>, vector<64x128xf32>,
    %c0_7 = arith.constant 0 : index
    %c0_8 = arith.constant 0 : index
    %14 = vector.load %arg8[%c0_7, %c0_8] : memref<64x1xf32, #tpu.memory_space<vmem>>, vector<64x1xf32>
    %cst_9 = arith.constant dense<0.000000e+00> : vector<64xf32>
    %15 = vector.multi_reduction <add>, %4, %cst_9 [1] : vector<64x128xf32> to vector<64xf32>
    %16 = vector.shape_cast %15 : vector<64xf32> to vector<64x1xf32>
    %17 = arith.addf %14, %16 : vector<64x1xf32>
    %c0_10 = arith.constant 0 : index
    %c0_11 = arith.constant 0 : index
    %18 = vector.load %arg8[%c0_10, %c0_11] : memref<64x1xf32, #tpu.memory_space<vmem>>, vector<64x1xf32>
    tpu.vector_store %arg8[%c0_10, %c0_11], %17 {strides = array<i32>} : memref<64x1xf32, #tpu.memory_space<vmem>>, vector<64x1xf32>,
    %c0_i32_12 = arith.constant 0 : i32
    %19 = arith.cmpi eq, %arg1, %c0_i32_12 : i32
    %20 = arith.extui %19 : i1 to i32
    %c0_i32_13 = arith.constant 0 : i32
    %21 = arith.cmpi ne, %20, %c0_i32_13 : i32
    scf.if %21 {
      %c0_14 = arith.constant 0 : index
      %c0_15 = arith.constant 0 : index
      %22 = vector.load %arg8[%c0_14, %c0_15] : memref<64x1xf32, #tpu.memory_space<vmem>>, vector<64x1xf32>
      %cst_16 = arith.constant 1.000000e+00 : f32
      %23 = vector.broadcast %cst_16 : f32 to vector<64x1xf32>
      %24 = arith.maximumf %22, %23 : vector<64x1xf32>
      %25 = tpu.reciprocal %24 {approx = true} : vector<64x1xf32> -> vector<64x1xf32>
      %c0_17 = arith.constant 0 : index
      %c0_18 = arith.constant 0 : index
      %26 = vector.load %arg7[%c0_17, %c0_18] : memref<64x128xf32, #tpu.memory_space<vmem>>, vector<64x128xf32>
      %27 = vector.broadcast %25 : vector<64x1xf32> to vector<64x128xf32>
      %28 = arith.mulf %26, %27 : vector<64x128xf32>
      %c0_19 = arith.constant 0 : index
      %c0_20 = arith.constant 0 : index
      %29 = vector.load %arg4[%c0_19, %c0_20] : memref<64x128xbf16, #tpu.memory_space<vmem>>, vector<64x128xbf16>
      %30 = arith.extf %29 : vector<64x128xbf16> to vector<64x128xf32>
      %31 = arith.addf %28, %30 : vector<64x128xf32>
      %c0_21 = arith.constant 0 : index
      %c0_22 = arith.constant 0 : index
      %32 = vector.load %arg5[%c0_21, %c0_22] : memref<1x128xf32, #tpu.memory_space<vmem>>, vector<1x128xf32>
      %33 = vector.broadcast %32 : vector<1x128xf32> to vector<64x128xf32>
      %34 = arith.addf %31, %33 : vector<64x128xf32>
      %cst_23 = arith.constant 0.000000e+00 : f32
      %35 = vector.broadcast %cst_23 : f32 to vector<64x128xf32>
      %36 = arith.maximumf %34, %35 : vector<64x128xf32>
      %37 = arith.truncf %36 : vector<64x128xf32> to vector<64x128xbf16>
      %c0_24 = arith.constant 0 : index
      %c0_25 = arith.constant 0 : index
      %38 = vector.load %arg6[%c0_24, %c0_25] : memref<64x128xbf16, #tpu.memory_space<vmem>>, vector<64x128xbf16>
      tpu.vector_store %arg6[%c0_24, %c0_25], %37 {strides = array<i32>} : memref<64x128xbf16, #tpu.memory_space<vmem>>, vector<64x128xbf16>,
    } else {
    }
    return
  }
  func.func @transform_0(%arg0: i32, %arg1: i32) -> (i32, i32) {
    %c0_i32 = arith.constant 0 : i32
    return %arg0, %arg1 : i32, i32
  }
  func.func @transform_1(%arg0: i32, %arg1: i32) -> (i32, i32) {
    %c0_i32 = arith.constant 0 : i32
    %c1_i32 = arith.constant 1 : i32
    %c0_i32_0 = arith.constant 0 : i32
    return %c0_i32, %c1_i32 : i32, i32
  }
  func.func @transform_2(%arg0: i32, %arg1: i32) -> (i32, i32) {
    %c0_i32 = arith.constant 0 : i32
    %c0_i32_0 = arith.constant 0 : i32
    return %arg0, %c0_i32 : i32, i32
  }
  func.func @transform_3(%arg0: i32, %arg1: i32) -> (i32, i32) {
    %c0_i32 = arith.constant 0 : i32
    %c0_i32_0 = arith.constant 0 : i32
    %c0_i32_1 = arith.constant 0 : i32
    return %c0_i32, %c0_i32_0 : i32, i32
  }
  func.func @transform_4(%arg0: i32, %arg1: i32) -> (i32, i32) {
    %c0_i32 = arith.constant 0 : i32
    %c0_i32_0 = arith.constant 0 : i32
    return %arg0, %c0_i32 : i32, i32
  }
}

module attributes {stable_mosaic.version = 11 : i64} {
  func.func @_matmul_kernel(%arg0: i32, %arg1: i32, %arg2: i32, %arg3: memref<64x128xbf16, #tpu.memory_space<vmem>>, %arg4: memref<128x256xbf16, #tpu.memory_space<vmem>>, %arg5: memref<64x256xbf16, #tpu.memory_space<vmem>>, %arg6: memref<64x256xf32, #tpu.memory_space<vmem>>) attributes {dimension_semantics = [#tpu.dimension_semantics<parallel>, #tpu.dimension_semantics<parallel>, #tpu.dimension_semantics<arbitrary>], iteration_bounds = array<i64: 2, 1, 1>, scalar_prefetch = 0 : i64, scratch_operands = 1 : i64, tpu.core_type = #tpu.core_type<tc>, window_params = [{transform_indices = @transform_0, window_bounds = array<i64: 64, 128>}, {transform_indices = @transform_1, window_bounds = array<i64: 128, 256>}, {transform_indices = @transform_2, window_bounds = array<i64: 64, 256>}]} {
    %c0_i32 = arith.constant 0 : i32
    %0 = arith.cmpi eq, %arg2, %c0_i32 : i32
    %1 = arith.extui %0 : i1 to i32
    %c0_i32_0 = arith.constant 0 : i32
    %2 = arith.cmpi ne, %1, %c0_i32_0 : i32
    scf.if %2 {
      %cst_10 = arith.constant 0.000000e+00 : f32
      %12 = vector.broadcast %cst_10 : f32 to vector<64x256xf32>
      %c0_11 = arith.constant 0 : index
      %c0_12 = arith.constant 0 : index
      %13 = vector.load %arg6[%c0_11, %c0_12] : memref<64x256xf32, #tpu.memory_space<vmem>>, vector<64x256xf32>
      tpu.vector_store %arg6[%c0_11, %c0_12], %12 {strides = array<i32>} : memref<64x256xf32, #tpu.memory_space<vmem>>, vector<64x256xf32>,
    } else {
    }
    %c0 = arith.constant 0 : index
    %c0_1 = arith.constant 0 : index
    %3 = vector.load %arg6[%c0, %c0_1] : memref<64x256xf32, #tpu.memory_space<vmem>>, vector<64x256xf32>
    %c0_2 = arith.constant 0 : index
    %c0_3 = arith.constant 0 : index
    %4 = vector.load %arg3[%c0_2, %c0_3] : memref<64x128xbf16, #tpu.memory_space<vmem>>, vector<64x128xbf16>
    %c0_4 = arith.constant 0 : index
    %c0_5 = arith.constant 0 : index
    %5 = vector.load %arg4[%c0_4, %c0_5] : memref<128x256xbf16, #tpu.memory_space<vmem>>, vector<128x256xbf16>
    %cst = arith.constant dense<0.000000e+00> : vector<64x256xf32>
    %6 = tpu.matmul %4, %5, %cst {dimension_numbers = #tpu.dot_dimension_numbers<[1], [0], [0], [1], [0, 0, 1, 1], [], []>} : vector<64x128xbf16>, vector<128x256xbf16>, vector<64x256xf32> -> vector<64x256xf32>
    %7 = arith.addf %3, %6 : vector<64x256xf32>
    %c0_6 = arith.constant 0 : index
    %c0_7 = arith.constant 0 : index
    %8 = vector.load %arg6[%c0_6, %c0_7] : memref<64x256xf32, #tpu.memory_space<vmem>>, vector<64x256xf32>
    tpu.vector_store %arg6[%c0_6, %c0_7], %7 {strides = array<i32>} : memref<64x256xf32, #tpu.memory_space<vmem>>, vector<64x256xf32>,
    %c0_i32_8 = arith.constant 0 : i32
    %9 = arith.cmpi eq, %arg2, %c0_i32_8 : i32
    %10 = arith.extui %9 : i1 to i32
    %c0_i32_9 = arith.constant 0 : i32
    %11 = arith.cmpi ne, %10, %c0_i32_9 : i32
    scf.if %11 {
      %c0_10 = arith.constant 0 : index
      %c0_11 = arith.constant 0 : index
      %12 = vector.load %arg6[%c0_10, %c0_11] : memref<64x256xf32, #tpu.memory_space<vmem>>, vector<64x256xf32>
      %13 = arith.truncf %12 : vector<64x256xf32> to vector<64x256xbf16>
      %c0_12 = arith.constant 0 : index
      %c0_13 = arith.constant 0 : index
      %14 = vector.load %arg5[%c0_12, %c0_13] : memref<64x256xbf16, #tpu.memory_space<vmem>>, vector<64x256xbf16>
      tpu.vector_store %arg5[%c0_12, %c0_13], %13 {strides = array<i32>} : memref<64x256xbf16, #tpu.memory_space<vmem>>, vector<64x256xbf16>,
    } else {
    }
    return
  }
  func.func @transform_0(%arg0: i32, %arg1: i32, %arg2: i32) -> (i32, i32) {
    %c0_i32 = arith.constant 0 : i32
    return %arg0, %arg2 : i32, i32
  }
  func.func @transform_1(%arg0: i32, %arg1: i32, %arg2: i32) -> (i32, i32) {
    %c0_i32 = arith.constant 0 : i32
    return %arg2, %arg1 : i32, i32
  }
  func.func @transform_2(%arg0: i32, %arg1: i32, %arg2: i32) -> (i32, i32) {
    %c0_i32 = arith.constant 0 : i32
    return %arg0, %arg1 : i32, i32
  }
}

module attributes {stable_mosaic.version = 11 : i64} {
  func.func @_sage_agg_kernel(%arg0: i32, %arg1: i32, %arg2: memref<64x128xi8, #tpu.memory_space<vmem>>, %arg3: memref<128x128xbf16, #tpu.memory_space<vmem>>, %arg4: memref<64x128xbf16, #tpu.memory_space<vmem>>, %arg5: memref<1x128xf32, #tpu.memory_space<vmem>>, %arg6: memref<64x128xbf16, #tpu.memory_space<vmem>>, %arg7: memref<64x128xf32, #tpu.memory_space<vmem>>, %arg8: memref<64x1xf32, #tpu.memory_space<vmem>>) attributes {dimension_semantics = [#tpu.dimension_semantics<parallel>, #tpu.dimension_semantics<arbitrary>], iteration_bounds = array<i64: 2, 1>, scalar_prefetch = 0 : i64, scratch_operands = 2 : i64, tpu.core_type = #tpu.core_type<tc>, window_params = [{transform_indices = @transform_0, window_bounds = array<i64: 64, 128>}, {transform_indices = @transform_1, window_bounds = array<i64: 128, 128>}, {transform_indices = @transform_2, window_bounds = array<i64: 64, 128>}, {pipeline_mode = #tpu.pipeline_mode<synchronous>, transform_indices = @transform_3, window_bounds = array<i64: 1, 128>}, {transform_indices = @transform_4, window_bounds = array<i64: 64, 128>}]} {
    %c0_i32 = arith.constant 0 : i32
    %0 = arith.cmpi eq, %arg1, %c0_i32 : i32
    %1 = arith.extui %0 : i1 to i32
    %c0_i32_0 = arith.constant 0 : i32
    %2 = arith.cmpi ne, %1, %c0_i32_0 : i32
    scf.if %2 {
      %cst_14 = arith.constant 0.000000e+00 : f32
      %22 = vector.broadcast %cst_14 : f32 to vector<64x128xf32>
      %c0_15 = arith.constant 0 : index
      %c0_16 = arith.constant 0 : index
      %23 = vector.load %arg7[%c0_15, %c0_16] : memref<64x128xf32, #tpu.memory_space<vmem>>, vector<64x128xf32>
      tpu.vector_store %arg7[%c0_15, %c0_16], %22 {strides = array<i32>} : memref<64x128xf32, #tpu.memory_space<vmem>>, vector<64x128xf32>,
      %cst_17 = arith.constant 0.000000e+00 : f32
      %24 = vector.broadcast %cst_17 : f32 to vector<64x1xf32>
      %c0_18 = arith.constant 0 : index
      %c0_19 = arith.constant 0 : index
      %25 = vector.load %arg8[%c0_18, %c0_19] : memref<64x1xf32, #tpu.memory_space<vmem>>, vector<64x1xf32>
      tpu.vector_store %arg8[%c0_18, %c0_19], %24 {strides = array<i32>} : memref<64x1xf32, #tpu.memory_space<vmem>>, vector<64x1xf32>,
    } else {
    }
    %c0 = arith.constant 0 : index
    %c0_1 = arith.constant 0 : index
    %3 = vector.load %arg2[%c0, %c0_1] : memref<64x128xi8, #tpu.memory_space<vmem>>, vector<64x128xi8>
    %4 = arith.sitofp %3 : vector<64x128xi8> to vector<64x128xf32>
    %c128_i32 = arith.constant 128 : i32
    %5 = arith.muli %arg1, %c128_i32 : i32
    %6 = tpu.assume_multiple %5, 128 : i32
    %7 = arith.index_cast %6 : i32 to index
    %c0_2 = arith.constant 0 : index
    %8 = vector.load %arg3[%7, %c0_2] : memref<128x128xbf16, #tpu.memory_space<vmem>>, vector<128x128xbf16>
    %c0_3 = arith.constant 0 : index
    %c0_4 = arith.constant 0 : index
    %9 = vector.load %arg7[%c0_3, %c0_4] : memref<64x128xf32, #tpu.memory_space<vmem>>, vector<64x128xf32>
    %10 = arith.truncf %4 : vector<64x128xf32> to vector<64x128xbf16>
    %cst = arith.constant dense<0.000000e+00> : vector<64x128xf32>
    %11 = tpu.matmul %10, %8, %cst {dimension_numbers = #tpu.dot_dimension_numbers<[1], [0], [0], [1], [0, 0, 1, 1], [], []>} : vector<64x128xbf16>, vector<128x128xbf16>, vector<64x128xf32> -> vector<64x128xf32>
    %12 = arith.addf %9, %11 : vector<64x128xf32>
    %c0_5 = arith.constant 0 : index
    %c0_6 = arith.constant 0 : index
    %13 = vector.load %arg7[%c0_5, %c0_6] : memref<64x128xf32, #tpu.memory_space<vmem>>, vector<64x128xf32>
    tpu.vector_store %arg7[%c0_5, %c0_6], %12 {strides = array<i32>} : memref<64x128xf32, #tpu.memory_space<vmem>>, vector<64x128xf32>,
    %c0_7 = arith.constant 0 : index
    %c0_8 = arith.constant 0 : index
    %14 = vector.load %arg8[%c0_7, %c0_8] : memref<64x1xf32, #tpu.memory_space<vmem>>, vector<64x1xf32>
    %cst_9 = arith.constant dense<0.000000e+00> : vector<64xf32>
    %15 = vector.multi_reduction <add>, %4, %cst_9 [1] : vector<64x128xf32> to vector<64xf32>
    %16 = vector.shape_cast %15 : vector<64xf32> to vector<64x1xf32>
    %17 = arith.addf %14, %16 : vector<64x1xf32>
    %c0_10 = arith.constant 0 : index
    %c0_11 = arith.constant 0 : index
    %18 = vector.load %arg8[%c0_10, %c0_11] : memref<64x1xf32, #tpu.memory_space<vmem>>, vector<64x1xf32>
    tpu.vector_store %arg8[%c0_10, %c0_11], %17 {strides = array<i32>} : memref<64x1xf32, #tpu.memory_space<vmem>>, vector<64x1xf32>,
    %c0_i32_12 = arith.constant 0 : i32
    %19 = arith.cmpi eq, %arg1, %c0_i32_12 : i32
    %20 = arith.extui %19 : i1 to i32
    %c0_i32_13 = arith.constant 0 : i32
    %21 = arith.cmpi ne, %20, %c0_i32_13 : i32
    scf.if %21 {
      %c0_14 = arith.constant 0 : index
      %c0_15 = arith.constant 0 : index
      %22 = vector.load %arg8[%c0_14, %c0_15] : memref<64x1xf32, #tpu.memory_space<vmem>>, vector<64x1xf32>
      %cst_16 = arith.constant 1.000000e+00 : f32
      %23 = vector.broadcast %cst_16 : f32 to vector<64x1xf32>
      %24 = arith.maximumf %22, %23 : vector<64x1xf32>
      %25 = tpu.reciprocal %24 {approx = true} : vector<64x1xf32> -> vector<64x1xf32>
      %c0_17 = arith.constant 0 : index
      %c0_18 = arith.constant 0 : index
      %26 = vector.load %arg7[%c0_17, %c0_18] : memref<64x128xf32, #tpu.memory_space<vmem>>, vector<64x128xf32>
      %27 = vector.broadcast %25 : vector<64x1xf32> to vector<64x128xf32>
      %28 = arith.mulf %26, %27 : vector<64x128xf32>
      %c0_19 = arith.constant 0 : index
      %c0_20 = arith.constant 0 : index
      %29 = vector.load %arg4[%c0_19, %c0_20] : memref<64x128xbf16, #tpu.memory_space<vmem>>, vector<64x128xbf16>
      %30 = arith.extf %29 : vector<64x128xbf16> to vector<64x128xf32>
      %31 = arith.addf %28, %30 : vector<64x128xf32>
      %c0_21 = arith.constant 0 : index
      %c0_22 = arith.constant 0 : index
      %32 = vector.load %arg5[%c0_21, %c0_22] : memref<1x128xf32, #tpu.memory_space<vmem>>, vector<1x128xf32>
      %33 = vector.broadcast %32 : vector<1x128xf32> to vector<64x128xf32>
      %34 = arith.addf %31, %33 : vector<64x128xf32>
      %35 = arith.truncf %34 : vector<64x128xf32> to vector<64x128xbf16>
      %c0_23 = arith.constant 0 : index
      %c0_24 = arith.constant 0 : index
      %36 = vector.load %arg6[%c0_23, %c0_24] : memref<64x128xbf16, #tpu.memory_space<vmem>>, vector<64x128xbf16>
      tpu.vector_store %arg6[%c0_23, %c0_24], %35 {strides = array<i32>} : memref<64x128xbf16, #tpu.memory_space<vmem>>, vector<64x128xbf16>,
    } else {
    }
    return
  }
  func.func @transform_0(%arg0: i32, %arg1: i32) -> (i32, i32) {
    %c0_i32 = arith.constant 0 : i32
    return %arg0, %arg1 : i32, i32
  }
  func.func @transform_1(%arg0: i32, %arg1: i32) -> (i32, i32) {
    %c0_i32 = arith.constant 0 : i32
    %c1_i32 = arith.constant 1 : i32
    %c0_i32_0 = arith.constant 0 : i32
    return %c0_i32, %c1_i32 : i32, i32
  }
  func.func @transform_2(%arg0: i32, %arg1: i32) -> (i32, i32) {
    %c0_i32 = arith.constant 0 : i32
    %c0_i32_0 = arith.constant 0 : i32
    return %arg0, %c0_i32 : i32, i32
  }
  func.func @transform_3(%arg0: i32, %arg1: i32) -> (i32, i32) {
    %c0_i32 = arith.constant 0 : i32
    %c0_i32_0 = arith.constant 0 : i32
    %c0_i32_1 = arith.constant 0 : i32
    return %c0_i32, %c0_i32_0 : i32, i32
  }
  func.func @transform_4(%arg0: i32, %arg1: i32) -> (i32, i32) {
    %c0_i32 = arith.constant 0 : i32
    %c0_i32_0 = arith.constant 0 : i32
    return %arg0, %c0_i32 : i32, i32
  }
}

module attributes {stable_mosaic.version = 11 : i64} {
  func.func @_predictor_kernel(%arg0: i32, %arg1: memref<64x128xbf16, #tpu.memory_space<vmem>>, %arg2: memref<64x128xbf16, #tpu.memory_space<vmem>>, %arg3: memref<128x128xbf16, #tpu.memory_space<vmem>>, %arg4: memref<1x128xf32, #tpu.memory_space<vmem>>, %arg5: memref<128x128xbf16, #tpu.memory_space<vmem>>, %arg6: memref<1x128xf32, #tpu.memory_space<vmem>>, %arg7: memref<1x128xf32, #tpu.memory_space<vmem>>, %arg8: memref<1x1xf32, #tpu.memory_space<vmem>>, %arg9: memref<64x1xf32, #tpu.memory_space<vmem>>) attributes {dimension_semantics = [#tpu.dimension_semantics<parallel>], iteration_bounds = array<i64: 2>, scalar_prefetch = 0 : i64, scratch_operands = 0 : i64, tpu.core_type = #tpu.core_type<tc>, window_params = [{transform_indices = @transform_0, window_bounds = array<i64: 64, 128>}, {transform_indices = @transform_1, window_bounds = array<i64: 64, 128>}, {pipeline_mode = #tpu.pipeline_mode<synchronous>, transform_indices = @transform_2, window_bounds = array<i64: 128, 128>}, {pipeline_mode = #tpu.pipeline_mode<synchronous>, transform_indices = @transform_3, window_bounds = array<i64: 1, 128>}, {pipeline_mode = #tpu.pipeline_mode<synchronous>, transform_indices = @transform_4, window_bounds = array<i64: 128, 128>}, {pipeline_mode = #tpu.pipeline_mode<synchronous>, transform_indices = @transform_5, window_bounds = array<i64: 1, 128>}, {pipeline_mode = #tpu.pipeline_mode<synchronous>, transform_indices = @transform_6, window_bounds = array<i64: 1, 128>}, {pipeline_mode = #tpu.pipeline_mode<synchronous>, transform_indices = @transform_7, window_bounds = array<i64: 1, 1>}, {transform_indices = @transform_8, window_bounds = array<i64: 64, 1>}]} {
    %c0 = arith.constant 0 : index
    %c0_0 = arith.constant 0 : index
    %0 = vector.load %arg1[%c0, %c0_0] : memref<64x128xbf16, #tpu.memory_space<vmem>>, vector<64x128xbf16>
    %c0_1 = arith.constant 0 : index
    %c0_2 = arith.constant 0 : index
    %1 = vector.load %arg2[%c0_1, %c0_2] : memref<64x128xbf16, #tpu.memory_space<vmem>>, vector<64x128xbf16>
    %2 = arith.mulf %0, %1 : vector<64x128xbf16>
    %c0_3 = arith.constant 0 : index
    %c0_4 = arith.constant 0 : index
    %3 = vector.load %arg3[%c0_3, %c0_4] : memref<128x128xbf16, #tpu.memory_space<vmem>>, vector<128x128xbf16>
    %cst = arith.constant dense<0.000000e+00> : vector<64x128xf32>
    %4 = tpu.matmul %2, %3, %cst {dimension_numbers = #tpu.dot_dimension_numbers<[1], [0], [0], [1], [0, 0, 1, 1], [], []>} : vector<64x128xbf16>, vector<128x128xbf16>, vector<64x128xf32> -> vector<64x128xf32>
    %c0_5 = arith.constant 0 : index
    %c0_6 = arith.constant 0 : index
    %5 = vector.load %arg4[%c0_5, %c0_6] : memref<1x128xf32, #tpu.memory_space<vmem>>, vector<1x128xf32>
    %6 = vector.broadcast %5 : vector<1x128xf32> to vector<64x128xf32>
    %7 = arith.addf %4, %6 : vector<64x128xf32>
    %cst_7 = arith.constant 0.000000e+00 : f32
    %8 = vector.broadcast %cst_7 : f32 to vector<64x128xf32>
    %9 = arith.maximumf %7, %8 : vector<64x128xf32>
    %10 = arith.truncf %9 : vector<64x128xf32> to vector<64x128xbf16>
    %c0_8 = arith.constant 0 : index
    %c0_9 = arith.constant 0 : index
    %11 = vector.load %arg5[%c0_8, %c0_9] : memref<128x128xbf16, #tpu.memory_space<vmem>>, vector<128x128xbf16>
    %cst_10 = arith.constant dense<0.000000e+00> : vector<64x128xf32>
    %12 = tpu.matmul %10, %11, %cst_10 {dimension_numbers = #tpu.dot_dimension_numbers<[1], [0], [0], [1], [0, 0, 1, 1], [], []>} : vector<64x128xbf16>, vector<128x128xbf16>, vector<64x128xf32> -> vector<64x128xf32>
    %c0_11 = arith.constant 0 : index
    %c0_12 = arith.constant 0 : index
    %13 = vector.load %arg6[%c0_11, %c0_12] : memref<1x128xf32, #tpu.memory_space<vmem>>, vector<1x128xf32>
    %14 = vector.broadcast %13 : vector<1x128xf32> to vector<64x128xf32>
    %15 = arith.addf %12, %14 : vector<64x128xf32>
    %cst_13 = arith.constant 0.000000e+00 : f32
    %16 = vector.broadcast %cst_13 : f32 to vector<64x128xf32>
    %17 = arith.maximumf %15, %16 : vector<64x128xf32>
    %c0_14 = arith.constant 0 : index
    %c0_15 = arith.constant 0 : index
    %18 = vector.load %arg7[%c0_14, %c0_15] : memref<1x128xf32, #tpu.memory_space<vmem>>, vector<1x128xf32>
    %19 = vector.broadcast %18 : vector<1x128xf32> to vector<64x128xf32>
    %20 = arith.mulf %17, %19 : vector<64x128xf32>
    %cst_16 = arith.constant dense<0.000000e+00> : vector<64xf32>
    %21 = vector.multi_reduction <add>, %20, %cst_16 [1] : vector<64x128xf32> to vector<64xf32>
    %22 = vector.shape_cast %21 : vector<64xf32> to vector<64x1xf32>
    %c0_17 = arith.constant 0 : index
    %c0_18 = arith.constant 0 : index
    %23 = vector.load %arg8[%c0_17, %c0_18] : memref<1x1xf32, #tpu.memory_space<vmem>>, vector<1x1xf32>
    %24 = vector.broadcast %23 : vector<1x1xf32> to vector<64x1xf32>
    %25 = arith.addf %22, %24 : vector<64x1xf32>
    %c0_19 = arith.constant 0 : index
    %c0_20 = arith.constant 0 : index
    %26 = vector.load %arg9[%c0_19, %c0_20] : memref<64x1xf32, #tpu.memory_space<vmem>>, vector<64x1xf32>
    tpu.vector_store %arg9[%c0_19, %c0_20], %25 {strides = array<i32>} : memref<64x1xf32, #tpu.memory_space<vmem>>, vector<64x1xf32>,
    return
  }
  func.func @transform_0(%arg0: i32) -> (i32, i32) {
    %c0_i32 = arith.constant 0 : i32
    %c0_i32_0 = arith.constant 0 : i32
    return %arg0, %c0_i32 : i32, i32
  }
  func.func @transform_1(%arg0: i32) -> (i32, i32) {
    %c0_i32 = arith.constant 0 : i32
    %c0_i32_0 = arith.constant 0 : i32
    return %arg0, %c0_i32 : i32, i32
  }
  func.func @transform_2(%arg0: i32) -> (i32, i32) {
    %c0_i32 = arith.constant 0 : i32
    %c0_i32_0 = arith.constant 0 : i32
    %c0_i32_1 = arith.constant 0 : i32
    return %c0_i32, %c0_i32_0 : i32, i32
  }
  func.func @transform_3(%arg0: i32) -> (i32, i32) {
    %c0_i32 = arith.constant 0 : i32
    %c0_i32_0 = arith.constant 0 : i32
    %c0_i32_1 = arith.constant 0 : i32
    return %c0_i32, %c0_i32_0 : i32, i32
  }
  func.func @transform_4(%arg0: i32) -> (i32, i32) {
    %c0_i32 = arith.constant 0 : i32
    %c0_i32_0 = arith.constant 0 : i32
    %c0_i32_1 = arith.constant 0 : i32
    return %c0_i32, %c0_i32_0 : i32, i32
  }
  func.func @transform_5(%arg0: i32) -> (i32, i32) {
    %c0_i32 = arith.constant 0 : i32
    %c0_i32_0 = arith.constant 0 : i32
    %c0_i32_1 = arith.constant 0 : i32
    return %c0_i32, %c0_i32_0 : i32, i32
  }
  func.func @transform_6(%arg0: i32) -> (i32, i32) {
    %c0_i32 = arith.constant 0 : i32
    %c0_i32_0 = arith.constant 0 : i32
    %c0_i32_1 = arith.constant 0 : i32
    return %c0_i32, %c0_i32_0 : i32, i32
  }
  func.func @transform_7(%arg0: i32) -> (i32, i32) {
    %c0_i32 = arith.constant 0 : i32
    %c0_i32_0 = arith.constant 0 : i32
    %c0_i32_1 = arith.constant 0 : i32
    return %c0_i32, %c0_i32_0 : i32, i32
  }
  func.func @transform_8(%arg0: i32) -> (i32, i32) {
    %c0_i32 = arith.constant 0 : i32
    %c0_i32_0 = arith.constant 0 : i32
    return %arg0, %c0_i32 : i32, i32
  }
}

</mosaic_0001>

<bundles_post_ra>
// kernel: sage_forward.8
= control target key start
LH: loop header
LB: loop body
LE: loop exit
PB: predicated region body
PF: predicated region fallthrough
CT: control target
= control target key end

     0   :  { %s1222_s15 = smov 0   ;;  %s1224_s16 = smov 0   ;;  %s1396_s0 = inlined_call_operand.vmem [shape: s8[128,128], index: 0, kind: input, shape index: {}]   ;;  %s1397_s1 = inlined_call_operand.vmem [shape: bf16[128,256], index: 1, kind: input, shape index: {}, may-alias: {1,2}]   ;;  %s1398_s2 = inlined_call_operand.vmem [shape: bf16[128,256], index: 2, kind: input, shape index: {}, may-alias: {1,2}]   ;;  %s1399_s3 = inlined_call_operand.vmem [shape: f32[1,128], index: 3, kind: input, shape index: {}]   ;;  %s1400_s4 = inlined_call_operand.vmem [shape: bf16[128,128], index: 4, kind: output, shape index: {}]  }
   0x1   :  { %s1226_s17 = smov 0   ;;  %s1228_s18 = smov 0  }
   0x2   :  { %s1230_s19 = smov 0  }
   0x3 LB: > { %s933_s20 = sadd.s32 4294967295, %s1193_s19   ;;  %s26_s21 = sadd.s32 1, %s1189_s18  ;;  %s1193_s19 = sphi %s1230_s19, %s14_s19   ;;  %s1189_s18 = sphi %s1228_s18, %s1406_s18   ;;  %s1185_s17 = sphi %s1226_s17, %s1405_s17   ;;  %s1181_s16 = sphi %s1224_s16, %s1404_s16   ;;  %s1177_s15 = sphi %s1222_s15, %s1403_s15  }
   0x4   : > { %p28_p0 = scmp.ge.s32.totalorder %s26_s21, 2  ;;  %s82_s22 = sadd.s32 1, %s1181_s16 }
   0x5   : > { %p89_p1 = scmp.ne.s32.totalorder %s1181_s16, %s1177_s15  ;;  %p90_p2 = scmp.eq.s32.totalorder %s1193_s19, 0 }
   0x6   : > { %s1408_s21 = smov (%p28_p0, %s26_s21), 0  ;;  %p935_p4 = scmp.ge.s32.totalorder %s1193_s19, 1 }
   0x7   : > { %p1255_p3 = por %p90_p2, %p89_p1  ;;  %s79_s24 = ssub.s32 %s1189_s18, %s1408_s21 }
   0x8   : > { %p153_p5 = scmp.lt.s32.totalorder %s1193_s19, 3  ;;  %p80_p6 = scmp.eq.s32.totalorder %s79_s24, 0 }
   0xa   : > { %p1263_p7 = pnand %p935_p4, %p153_p5 }
   0xb   : > { %s1268_s26 = scalar_select %p80_p6, %s1181_s16, %s82_s22  }
   0xc   : > { %157 = sbr.rel (%p1263_p7) target bundleno = 31 (0x1f), region = 12  ;;  %p936_p8 = scmp.ne.s32.totalorder (!%p1263_p7), %s933_s20, 0 }
  0x13   : > { %161 = sbr.rel (%p936_p8) target bundleno = 31 (0x1f), region = 16  ;;  %v937_v0 = vld [vmem:[%s1397_s1 + $0x4] sm:$0xf] (!%p936_p8)  ;;  %v938_v1 = vld [vmem:[%s1397_s1 + $0xc] sm:$0xf] (!%p936_p8) }
  0x14   : > { %v939_v2 = vld [vmem:[%s1397_s1 + $0x14] sm:$0xf] (!%p936_p8)  ;;  %179 = vst [vmem:[#allocation4] sm:$0xf] (!%p936_p8), %v937_v0  ;;  %181 = vst [vmem:[#allocation4 + $0x4] sm:$0xf] (!%p936_p8), %v938_v1 }
  0x15   : > { %183 = vst [vmem:[#allocation4 + $0x8] sm:$0xf] (!%p936_p8), %v939_v2  ;;  %v940_v3 = vld [vmem:[%s1397_s1 + $0x1c] sm:$0xf] (!%p936_p8)  ;;  %v941_v4 = vld [vmem:[%s1397_s1 + $0x24] sm:$0xf] (!%p936_p8) }
  0x16   : > { %v942_v5 = vld [vmem:[%s1397_s1 + $0x2c] sm:$0xf] (!%p936_p8)  ;;  %185 = vst [vmem:[#allocation4 + $0xc] sm:$0xf] (!%p936_p8), %v940_v3  ;;  %187 = vst [vmem:[#allocation4 + $0x10] sm:$0xf] (!%p936_p8), %v941_v4 }
  0x17   : > { %189 = vst [vmem:[#allocation4 + $0x14] sm:$0xf] (!%p936_p8), %v942_v5  ;;  %v943_v6 = vld [vmem:[%s1397_s1 + $0x34] sm:$0xf] (!%p936_p8)  ;;  %v944_v7 = vld [vmem:[%s1397_s1 + $0x3c] sm:$0xf] (!%p936_p8) }
  0x18   : > { %v945_v8 = vld [vmem:[%s1397_s1 + $0x44] sm:$0xf] (!%p936_p8)  ;;  %191 = vst [vmem:[#allocation4 + $0x18] sm:$0xf] (!%p936_p8), %v943_v6  ;;  %193 = vst [vmem:[#allocation4 + $0x1c] sm:$0xf] (!%p936_p8), %v944_v7 }
  0x19   : > { %195 = vst [vmem:[#allocation4 + $0x20] sm:$0xf] (!%p936_p8), %v945_v8  ;;  %v946_v9 = vld [vmem:[%s1397_s1 + $0x4c] sm:$0xf] (!%p936_p8)  ;;  %v947_v10 = vld [vmem:[%s1397_s1 + $0x54] sm:$0xf] (!%p936_p8) }
  0x1a   : > { %v948_v11 = vld [vmem:[%s1397_s1 + $0x5c] sm:$0xf]  ;;  %197 = vst [vmem:[#allocation4 + $0x24] sm:$0xf] %v946_v9  ;;  %199 = vst [vmem:[#allocation4 + $0x28] sm:$0xf] %v947_v10 }
  0x1b   : > { %201 = vst [vmem:[#allocation4 + $0x2c] sm:$0xf] %v948_v11  ;;  %v949_v12 = vld [vmem:[%s1397_s1 + $0x64] sm:$0xf]  ;;  %v950_v13 = vld [vmem:[%s1397_s1 + $0x6c] sm:$0xf] }
  0x1c   : > { %v951_v14 = vld [vmem:[%s1397_s1 + $0x74] sm:$0xf]  ;;  %203 = vst [vmem:[#allocation4 + $0x30] sm:$0xf] %v949_v12  ;;  %205 = vst [vmem:[#allocation4 + $0x34] sm:$0xf] %v950_v13 }
  0x1d   : > { %207 = vst [vmem:[#allocation4 + $0x38] sm:$0xf] %v951_v14  ;;  %v952_v15 = vld [vmem:[%s1397_s1 + $0x7c] sm:$0xf] }
  0x1e   : > { %209 = vst [vmem:[#allocation4 + $0x3c] sm:$0xf] %v952_v15 }
  0x1f PF: > { %p953_p9 = scmp.ge.s32.totalorder %s1193_s19, 2 }
  0x21   : > { %268 = sbr.rel (%p953_p9) target bundleno = 49 (0x31), region = 61 }
  0x28   : > { %283 = sbr.rel (!%p1255_p3) target bundleno = 49 (0x31), region = 69  ;;  %s285_s22 = sand.u32 (%p1255_p3), 1, %s1181_s16  }
  0x29   : > { %s984_s24 = sshll.u32 (%p1255_p3), %s1189_s18, 6  ;;  %s954_s27 = sshll.u32 (%p1255_p3), %s285_s22, 5 }
  0x2a   : > { %s291_s30 = scalar_lea.vmem (%p1255_p3), %s1398_s2, %s984_s24  ;;  %s287_s5 = scalar_lea.vmem (%p1255_p3), [#allocation5], %s954_s27 }
  0x2b   : > { %v307_v16 = vld [vmem:[%s291_s30] sm:$0xf] (%p1255_p3)  ;;  %v309_v17 = vld [vmem:[%s291_s30 + $0x8] sm:$0xf] (%p1255_p3)  ;;  %v311_v18 = vld [vmem:[%s291_s30 + $0x10] sm:$0xf] (%p1255_p3) }
  0x2c   : > { %308 = vst [vmem:[%s287_s5] sm:$0xf] (%p1255_p3), %v307_v16  ;;  %310 = vst [vmem:[%s287_s5 + $0x4] sm:$0xf] (%p1255_p3), %v309_v17  ;;  %v313_v19 = vld [vmem:[%s291_s30 + $0x18] sm:$0xf] (%p1255_p3) }
  0x2d   : > { %v315_v20 = vld [vmem:[%s291_s30 + $0x20] sm:$0xf] (%p1255_p3)  ;;  %312 = vst [vmem:[%s287_s5 + $0x8] sm:$0xf] (%p1255_p3), %v311_v18  ;;  %314 = vst [vmem:[%s287_s5 + $0xc] sm:$0xf] (%p1255_p3), %v313_v19 }
  0x2e   : > { %316 = vst [vmem:[%s287_s5 + $0x10] sm:$0xf] (%p1255_p3), %v315_v20  ;;  %v317_v21 = vld [vmem:[%s291_s30 + $0x28] sm:$0xf] (%p1255_p3)  ;;  %v319_v22 = vld [vmem:[%s291_s30 + $0x30] sm:$0xf] (%p1255_p3) }
  0x2f   : > { %v321_v23 = vld [vmem:[%s291_s30 + $0x38] sm:$0xf]  ;;  %318 = vst [vmem:[%s287_s5 + $0x14] sm:$0xf] %v317_v21  ;;  %320 = vst [vmem:[%s287_s5 + $0x18] sm:$0xf] %v319_v22 }
  0x30   : > { %322 = vst [vmem:[%s287_s5 + $0x1c] sm:$0xf] %v321_v23 }
  0x31 PF: > { %364 = sbr.rel (%p1263_p7) target bundleno = 396 (0x18c), region = 110  ;;  %s960_s23 = sshll.u32 (!%p1263_p7), %s1185_s17, 1  ;;  %v1131_v24 = vld [vmem:[#allocation4] sm:$0xff] (!%p1263_p7)   ;;  %v1132_v25 = vld [vmem:[#allocation4 + $0x8] sm:$0xff] (!%p1263_p7)   ;;  %vm432_vm0 = vcmask (!%p1263_p7), 7168   ;;  %v1133_v26 = vld [vmem:[#allocation4 + $0x10] sm:$0xff] (!%p1263_p7)  }
  0x32   : > { %p404_p10 = scmp.lt.s32.totalorder (!%p1263_p7), %s960_s23, 3  ;;  %1047 = vmatprep.subr.bf16.mxu0 (!%p1263_p7), %v1131_v24  ;;  %1071 = vmatprep.subr.bf16.mxu1 (!%p1263_p7), %v1131_v24  ;;  %v1195_v27 = vmov (!%p1263_p7), 0.0   ;;  %v1134_v34 = vld [vmem:[#allocation4 + $0x18] sm:$0xff] (!%p1263_p7)   ;;  %v1135_v43 = vld [vmem:[#allocation4 + $0x20] sm:$0xff] (!%p1263_p7)   ;;  %v1136_v48 = vld [vmem:[#allocation4 + $0x28] sm:$0xff] (!%p1263_p7)   ;;  %v1196_v55 = vmov (!%p1263_p7), 0  }
  0x33   : > { %1048 = vmatpush3.bf16.msra.mxu0 (!%p1263_p7), %v1131_v24  ;;  %1079 = vmatpush3.bf16.msra.mxu1 (!%p1263_p7), %v1131_v24  ;;  %433 = vst.msk [vmem:[#allocation3] sm:$0xff] (!%p1263_p7), %vm432_vm0, %v1195_v27  ;;  %434 = vst.msk [vmem:[#allocation3 + $0x8] sm:$0xff] (!%p1263_p7), %vm432_vm0, %v1195_v27  ;;  %v1137_v51 = vld [vmem:[#allocation4 + $0x30] sm:$0xff] (!%p1263_p7)   ;;  %v1138_v52 = vld [vmem:[#allocation4 + $0x38] sm:$0xff] (!%p1263_p7)   ;;  %s370_s9 = sand.u32 (!%p1263_p7), 1, %s1177_s15   ;;  %s962_s12 = sshll.u32 (!%p1263_p7), %s1185_s17, 3 }
  0x34   : > { %1049 = vmatprep.subr.bf16.mxu0 (!%p1263_p7), %v1132_v25  ;;  %1072 = vmatprep.subr.bf16.mxu1 (!%p1263_p7), %v1132_v25  ;;  %435 = vst.msk [vmem:[#allocation3 + $0x10] sm:$0xff] (!%p1263_p7), %vm432_vm0, %v1195_v27  ;;  %436 = vst.msk [vmem:[#allocation3 + $0x18] sm:$0xff] (!%p1263_p7), %vm432_vm0, %v1195_v27  ;;  %s959_s10 = sshll.u32 (!%p1263_p7), %s370_s9, 5  ;;  %p414_p11 = scmp.lt.s32.totalorder (!%p1263_p7), %s962_s12, 15 }
  0x35   : > { %437 = vst.msk [vmem:[#allocation3 + $0x20] sm:$0xff] (!%p1263_p7), %vm432_vm0, %v1195_v27  ;;  %438 = vst.msk [vmem:[#allocation3 + $0x28] sm:$0xff] (!%p1263_p7), %vm432_vm0, %v1195_v27  ;;  %1129 = vset.pattern.permute.xlu0 (!%p1263_p7), %v1196_v55  ;;  %1130 = vset.pattern.permute.xlu1 (!%p1263_p7), %v1196_v55  ;;  %s1361_s11 = scalar_lea.vmem (!%p1263_p7), [#allocation5], %s959_s10 }
  0x36   : > { %439 = vst.msk [vmem:[#allocation3 + $0x30] sm:$0xff] (!%p1263_p7), %vm432_vm0, %v1195_v27  ;;  %440 = vst.msk [vmem:[#allocation3 + $0x38] sm:$0xff] (!%p1263_p7), %vm432_vm0, %v1195_v27 }
  0x37   : > { %1050 = vmatpush3.bf16.msra.mxu0 (!%p1263_p7), %v1132_v25  ;;  %1080 = vmatpush3.bf16.msra.mxu1 (!%p1263_p7), %v1132_v25 }
  0x38   : > { %s1410_s23 = smov (!%p404_p10, %s960_s23), 3  ;;  %1051 = vmatprep.subr.bf16.mxu0 %v1133_v26  ;;  %1073 = vmatprep.subr.bf16.mxu1 %v1133_v26  ;;  %s1412_s12 = smov (!%p414_p11, %s962_s12), 15 }
  0x39   : > { %s961_s6 = sshll.u32 %s1410_s23, 3  ;;  %s963_s15 = sshll.u32 %s1412_s12, 2 }
  0x3a   : > { %s410_s8 = scalar_lea.vmem %s1396_s0, %s961_s6  ;;  %v621_v56 = vld [vmem:[#allocation3] sm:$0xff]  ;;  %v622_v62 = vld [vmem:[#allocation3 + $0x8] sm:$0xff]  ;;  %s1372_s22 = scalar_lea.vmem %s1400_s4, %s963_s15 }
  0x3b   : > { %v1342_v28 = vld [vmem:[%s410_s8] sm:$0xff]  ;;  %v442_v33 = vld [vmem:[%s410_s8 + $0x8] sm:$0xff]  ;;  %1052 = vmatpush3.bf16.msra.mxu0 %v1133_v26  ;;  %1081 = vmatpush3.bf16.msra.mxu1 %v1133_v26  ;;  %v623_v57 = vld [vmem:[#allocation3 + $0x10] sm:$0xff] }
  0x3c   : > { %v443_v29 = vunpack.c.0.s8 %v1342_v28  ;;  %v444_v30 = vunpack.c.1.s8 %v1342_v28  ;;  %v445_v31 = vunpack.c.2.s8 %v1342_v28  ;;  %v446_v32 = vunpack.c.3.s8 %v1342_v28  ;;  %1053 = vmatprep.subr.bf16.mxu0 %v1134_v34  ;;  %1074 = vmatprep.subr.bf16.mxu1 %v1134_v34  ;;  %v624_v63 = vld [vmem:[#allocation3 + $0x18] sm:$0xff]  ;;  %v625_v4 = vld [vmem:[#allocation3 + $0x20] sm:$0xff]  ;;  %v626_v5 = vld [vmem:[#allocation3 + $0x28] sm:$0xff] }
  0x3d   : > { %v447_v37 = vunpack.c.0.s8 %v442_v33  ;;  %v448_v38 = vunpack.c.1.s8 %v442_v33  ;;  %v488_v41 = vunpack.c.l.s8.bf16 %v1342_v28  ;;  %v490_v42 = vunpack.c.l.s8.bf16 %v442_v33  ;;  %v627_v11 = vld [vmem:[#allocation3 + $0x30] sm:$0xff]  ;;  %v628_v12 = vld [vmem:[#allocation3 + $0x38] sm:$0xff] }
  0x3e   : > { %v451_v35 = vcvt.s32.f32 %v443_v29  ;;  %v453_v36 = vcvt.s32.f32 %v445_v31  ;;  %v452_v39 = vcvt.s32.f32 %v444_v30  ;;  %v454_v40 = vcvt.s32.f32 %v446_v32 }
  0x3f   : > { %1063 = vmatprep.mubr.bf16.mxu0 %v488_v41  ;;  %1067 = vmatprep.mubr.bf16.mxu1 %v490_v42  ;;  %v455_v44 = vcvt.s32.f32 %v447_v37  ;;  %v456_v45 = vcvt.s32.f32 %v448_v38  ;;  %v449_v46 = vunpack.c.2.s8 %v442_v33  ;;  %v450_v47 = vunpack.c.3.s8 %v442_v33 }
  0x40   : > { %629 = vadd.xlane.f32.xlu0 %v451_v35  ;;  %633 = vadd.xlane.f32.xlu1 %v453_v36  ;;  %v489_v53 = vunpack.c.h.s8.bf16 %v1342_v28  ;;  %v491_v54 = vunpack.c.h.s8.bf16 %v442_v33 }
  0x41   : > { %1054 = vmatpush3.bf16.msra.mxu0 %v1134_v34  ;;  %1082 = vmatpush3.bf16.msra.mxu1 %v1134_v34  ;;  %v457_v49 = vcvt.s32.f32 %v449_v46  ;;  %v458_v50 = vcvt.s32.f32 %v450_v47 }
  0x42   : > { %1055 = vmatprep.subr.bf16.mxu0 %v1135_v43  ;;  %1075 = vmatprep.subr.bf16.mxu1 %v1135_v43 }
  0x44   : > { %631 = vadd.xlane.f32.xlu0 %v452_v39  ;;  %635 = vadd.xlane.f32.xlu1 %v454_v40 }
  0x45   : > { %1056 = vmatpush3.bf16.msra.mxu0 %v1135_v43  ;;  %1083 = vmatpush3.bf16.msra.mxu1 %v1135_v43 }
  0x46   : > { %1057 = vmatprep.subr.bf16.mxu0 %v1136_v48  ;;  %1076 = vmatprep.subr.bf16.mxu1 %v1136_v48 }
  0x48   : > { %637 = vadd.xlane.f32.xlu0 %v455_v44  ;;  %639 = vadd.xlane.f32.xlu1 %v456_v45 }
  0x49   : > { %1058 = vmatpush3.bf16.msra.mxu0 %v1136_v48  ;;  %1084 = vmatpush3.bf16.msra.mxu1 %v1136_v48  ;;  %v994_v48 = vld [vmem:[%s1361_s11] sm:$0xff]  }
  0x4a   : > { %1059 = vmatprep.subr.bf16.mxu0 %v1137_v51  ;;  %1077 = vmatprep.subr.bf16.mxu1 %v1137_v51 }
  0x4c   : > { %641 = vadd.xlane.f32.xlu0 %v457_v49  ;;  %643 = vadd.xlane.f32.xlu1 %v458_v50  ;;  %v995_v49 = vunpack.c.l.bf16 %v994_v48 }
  0x4d   : > { %1060 = vmatpush3.bf16.msra.mxu0 %v1137_v51  ;;  %1085 = vmatpush3.bf16.msra.mxu1 %v1137_v51 }
  0x4e   : > { %1061 = vmatprep.subr.bf16.mxu0 %v1138_v52  ;;  %1078 = vmatprep.subr.bf16.mxu1 %v1138_v52 }
  0x51   : > { %1062 = vmatpush3.bf16.msra.mxu0 %v1138_v52  ;;  %1086 = vmatpush3.bf16.msra.mxu1 %v1138_v52 }
  0x54   : > { %1064 = vmatmul.mubr.bf16.vlgmr.msra.gmra.mrb[0].mxu0 %v489_v53  ;;  %1068 = vmatmul.mubr.bf16.vlgmr.msra.gmra.mrb[0].mxu1 %v491_v54  ;;  %v996_v53 = vunpack.c.h.bf16 %v994_v48  ;;  %v972_v54 = vld [vmem:[%s1399_s3] ss:$0 sm:$0xff] }
  0xcd   : > { %v630_v58 = vpop.xlane.xlu0 %629  ;;  %v634_v59 = vpop.xlane.xlu1 %633 }
  0xce   : > { %v645_v60 = vadd.f32 %v630_v58, %v621_v56  ;;  %v647_v61 = vadd.f32 %v634_v59, %v623_v57  ;;  %v1029_v56 = vld [vmem:[%s1361_s11 + $0x8] sm:$0xff]  }
  0xd0   : > { %654 = vst.msk [vmem:[#allocation3] sm:$0xff] %vm432_vm0, %v645_v60  ;;  %656 = vst.msk [vmem:[#allocation3 + $0x10] sm:$0xff] %vm432_vm0, %v647_v61  ;;  %v999_v60 = vunpack.c.l.bf16 %v1029_v56 }
  0xd1   : > { %v632_v0 = vpop.xlane.xlu0 %631  ;;  %v636_v1 = vpop.xlane.xlu1 %635 }
  0xd2   : > { %v646_v2 = vadd.f32 %v632_v0, %v622_v62  ;;  %v648_v3 = vadd.f32 %v636_v1, %v624_v63 }
  0xd4   : > { %655 = vst.msk [vmem:[#allocation3 + $0x8] sm:$0xff] %vm432_vm0, %v646_v2  ;;  %657 = vst.msk [vmem:[#allocation3 + $0x18] sm:$0xff] %vm432_vm0, %v648_v3  ;;  %v1000_v3 = vunpack.c.h.bf16 %v1029_v56 }
  0xd5   : > { %v638_v6 = vpop.xlane.xlu0 %637  ;;  %v640_v7 = vpop.xlane.xlu1 %639 }
  0xd6   : > { %v649_v8 = vadd.f32 %v638_v6, %v625_v4  ;;  %v650_v9 = vadd.f32 %v640_v7, %v626_v5  ;;  %v1030_v5 = vld [vmem:[%s1361_s11 + $0x10] sm:$0xff]  }
  0xd7   : > { %v665_v10 = vld [vmem:[#allocation3] sm:$0xff]  ;;  %v667_v16 = vld [vmem:[#allocation3 + $0x10] sm:$0xff] }
  0xd8   : > { %658 = vst.msk [vmem:[#allocation3 + $0x20] sm:$0xff] %vm432_vm0, %v649_v8  ;;  %659 = vst.msk [vmem:[#allocation3 + $0x28] sm:$0xff] %vm432_vm0, %v650_v9  ;;  %v673_v13 = vmax.f32 %v665_v10, 1.0  ;;  %v675_v21 = vmax.f32 %v667_v16, 1.0  ;;  %v1003_v10 = vunpack.c.l.bf16 %v1030_v5 }
  0xd9   : > { %v642_v14 = vpop.xlane.xlu0 %641  ;;  %v644_v15 = vpop.xlane.xlu1 %643 }
  0xda   : > { %1139 = vrcp.f32 %v673_v13  ;;  %v651_v17 = vadd.f32 %v642_v14, %v627_v11  ;;  %v652_v18 = vadd.f32 %v644_v15, %v628_v12 }
  0xdb   : > { %v666_v19 = vld [vmem:[#allocation3 + $0x8] sm:$0xff]  ;;  %v668_v22 = vld [vmem:[#allocation3 + $0x18] sm:$0xff] }
  0xdc   : > { %660 = vst.msk [vmem:[#allocation3 + $0x30] sm:$0xff] %vm432_vm0, %v651_v17  ;;  %661 = vst.msk [vmem:[#allocation3 + $0x38] sm:$0xff] %vm432_vm0, %v652_v18  ;;  %v674_v20 = vmax.f32 %v666_v19, 1.0  ;;  %v676_v23 = vmax.f32 %v668_v22, 1.0  ;;  %v1004_v17 = vunpack.c.h.bf16 %v1030_v5  ;;  %v1031_v19 = vld [vmem:[%s1361_s11 + $0x18] sm:$0xff]  }
  0xde   : > { %1141 = vrcp.f32 %v674_v20 }
  0xdf   : > { %1143 = vrcp.f32 %v675_v21  ;;  %v669_v24 = vld [vmem:[#allocation3 + $0x20] sm:$0xff]  ;;  %v670_v27 = vld [vmem:[#allocation3 + $0x28] sm:$0xff] }
  0xe0   : > { %1145 = vrcp.f32 %v676_v23  ;;  %v677_v26 = vmax.f32 %v669_v24, 1.0  ;;  %v678_v29 = vmax.f32 %v670_v27, 1.0  ;;  %v1007_v24 = vunpack.c.l.bf16 %v1031_v19 }
  0xe2   : > { %1147 = vrcp.f32 %v677_v26 }
  0xe3   : > { %v671_v30 = vld [vmem:[#allocation3 + $0x30] sm:$0xff]  ;;  %1149 = vrcp.f32 %v678_v29  ;;  %v672_v33 = vld [vmem:[#allocation3 + $0x38] sm:$0xff] }
  0xe4   : > { %v1140_v25 = vpop.eup %1139  ;;  %v679_v32 = vmax.f32 %v671_v30, 1.0  ;;  %v680_v35 = vmax.f32 %v672_v33, 1.0 }
  0xe5   : > { %699 = vperm.xlu0 %1129, %v1140_v25  }
  0xe6   : > { %1151 = vrcp.f32 %v679_v32 }
  0xe7   : > { %1153 = vrcp.f32 %v680_v35 }
  0xe8   : > { %v1142_v28 = vpop.eup %1141 }
  0xe9   : > { %704 = vperm.xlu1 %1130, %v1142_v28   ;;  %v1144_v31 = vpop.eup %1143 }
  0xea   : > { %v1146_v34 = vpop.eup %1145 }
  0xec   : > { %v1148_v36 = vpop.eup %1147 }
  0xed   : > { %709 = vperm.xlu1 %1130, %v1144_v31   ;;  %v1150_v37 = vpop.eup %1149  ;;  %v1008_v31 = vunpack.c.h.bf16 %v1031_v19 }
  0xf0   : > { %v1152_v38 = vpop.eup %1151 }
  0xf1   : > { %714 = vperm.xlu1 %1130, %v1146_v34   ;;  %v1154_v39 = vpop.eup %1153 }
  0xf5   : > { %719 = vperm.xlu1 %1130, %v1148_v36  }
  0xf9   : > { %724 = vperm.xlu1 %1130, %v1150_v37  }
  0xfd   : > { %729 = vperm.xlu1 %1130, %v1152_v38  }
 0x101   : > { %734 = vperm.xlu1 %1130, %v1154_v39  }
 0x127   : > { %v1065_v40 = vpop.f32.mrb[0].mxu0  ;;  %v1069_v41 = vpop.f32.mrb[0].mxu1 }
 0x128   : > { %v574_v42 = vpop.f32.mrb[1].mxu0  ;;  %v590_v43 = vpop.f32.mrb[1].mxu1 }
 0x129   : > { %v1066_v44 = vpop.f32.mrb[2].mxu0  ;;  %v1358_v45 = vpop.f32.mrb[2].mxu1 }
 0x12a   : > { %v577_v46 = vpop.f32.mrb[3].mxu0  ;;  %v593_v47 = vpop.f32.mrb[3].mxu1 }
 0x164   : > { %v700_v50 = vpop.permute.xlu0 %699 }
 0x165   : > { %v737_v51 = vmul.f32 %v700_v50, %v574_v42 }
 0x167   : > { %v761_v52 = vadd.f32 %v995_v49, %v737_v51 }
 0x168   : > { %v705_v55 = vpop.permute.xlu1 %704 }
 0x169   : > { %v738_v57 = vmul.f32 %v705_v55, %v577_v46  ;;  %v776_v58 = vadd.f32 %v972_v54, %v761_v52 }
 0x16b   : > { %v762_v59 = vadd.f32 %v996_v53, %v738_v57  ;;  %v784_v0 = vmax.f32 %v776_v58, 0.0 }
 0x16c   : > { %v710_v61 = vpop.permute.xlu1 %709 }
 0x16d   : > { %v777_v62 = vadd.f32 %v972_v54, %v762_v59  ;;  %v739_v63 = vmul.f32 %v1065_v40, %v710_v61 }
 0x16f   : > { %v785_v1 = vmax.f32 %v777_v62, 0.0  ;;  %v763_v2 = vadd.f32 %v999_v60, %v739_v63 }
 0x170   : > { %v715_v4 = vpop.permute.xlu1 %714 }
 0x171   : > { %v1012_v6 = vpack.c.bf16 %v785_v1, %v784_v0  ;;  %v740_v7 = vmul.f32 %v1066_v44, %v715_v4  ;;  %v778_v8 = vadd.f32 %v972_v54, %v763_v2 }
 0x173   : > { %1013 = vst [vmem:[%s1372_s22] sm:$0xff] %v1012_v6   ;;  %v764_v9 = vadd.f32 %v1000_v3, %v740_v7  ;;  %v786_v14 = vmax.f32 %v778_v8, 0.0 }
 0x174   : > { %v720_v11 = vpop.permute.xlu1 %719 }
 0x175   : > { %v779_v12 = vadd.f32 %v972_v54, %v764_v9  ;;  %v741_v13 = vmul.f32 %v720_v11, %v590_v43 }
 0x177   : > { %v787_v15 = vmax.f32 %v779_v12, 0.0  ;;  %v765_v16 = vadd.f32 %v1003_v10, %v741_v13 }
 0x178   : > { %v725_v18 = vpop.permute.xlu1 %724 }
 0x179   : > { %v1017_v20 = vpack.c.bf16 %v787_v15, %v786_v14  ;;  %v742_v21 = vmul.f32 %v725_v18, %v593_v47  ;;  %v780_v22 = vadd.f32 %v972_v54, %v765_v16 }
 0x17b   : > { %1032 = vst [vmem:[%s1372_s22 + $0x8] sm:$0xff] %v1017_v20   ;;  %v766_v23 = vadd.f32 %v1004_v17, %v742_v21  ;;  %v788_v28 = vmax.f32 %v780_v22, 0.0 }
 0x17c   : > { %v730_v25 = vpop.permute.xlu1 %729 }
 0x17d   : > { %v781_v26 = vadd.f32 %v972_v54, %v766_v23  ;;  %v743_v27 = vmul.f32 %v1069_v41, %v730_v25 }
 0x17f   : > { %v789_v29 = vmax.f32 %v781_v26, 0.0  ;;  %v767_v30 = vadd.f32 %v1007_v24, %v743_v27 }
 0x180   : > { %v735_v32 = vpop.permute.xlu1 %734 }
 0x181   : > { %v1022_v33 = vpack.c.bf16 %v789_v29, %v788_v28  ;;  %v744_v34 = vmul.f32 %v1358_v45, %v735_v32  ;;  %v782_v35 = vadd.f32 %v972_v54, %v767_v30 }
 0x183   : > { %1033 = vst [vmem:[%s1372_s22 + $0x10] sm:$0xff] %v1022_v33   ;;  %v768_v36 = vadd.f32 %v1008_v31, %v744_v34  ;;  %v790_v38 = vmax.f32 %v782_v35, 0.0 }
 0x185   : > { %v783_v37 = vadd.f32 %v972_v54, %v768_v36 }
 0x187   : > { %v791_v39 = vmax.f32 %v783_v37, 0.0 }
 0x189   : > { %v1027_v40 = vpack.c.bf16 %v791_v39, %v790_v38 }
 0x18b   : > { %1034 = vst [vmem:[%s1372_s22 + $0x18] sm:$0xff] %v1027_v40  }
 0x18c PF: > { %s14_s19 = sadd.s32 1, %s1193_s19   ;;  %s1403_s15 = smov %s1181_s16 }
 0x18d   : > { %p11_p12 = scmp.ge.s32.totalorder %s14_s19, 4   ;;  %s1404_s16 = smov %s1268_s26 }
 0x18e   : > { %s1405_s17 = smov %s1189_s18  ;;  %s1406_s18 = smov %s1408_s21 }
 0x18f   :  { %13 = sbr.rel (!%p11_p12) target bundleno = 3 (0x3), region = 170 }

// kernel: sage_forward.7
= control target key start
LH: loop header
LB: loop body
LE: loop exit
PB: predicated region body
PF: predicated region fallthrough
CT: control target
= control target key end

     0   :  { %7 = vsyncpa [#allocation4], 0  ;;  %s880_s9 = smov 0   ;;  %s882_s10 = smov 0   ;;  %s965_s0 = inlined_call_operand.vmem [shape: bf16[128,128], index: 0, kind: input, shape index: {}]   ;;  %s966_s1 = inlined_call_operand.hbm [shape: bf16[128,256], index: 1, kind: input, shape index: {}]   ;;  %s967_s2 = inlined_call_operand.vmem [shape: bf16[128,256], index: 2, kind: output, shape index: {}]  }
   0x1   :  { %s884_s11 = smov 0  }
   0x2 LB: > { %s672_s12 = sadd.s32 4294967295, %s859_s11   ;;  %s32_s13 = sadd.s32 1, %s855_s10  ;;  %s859_s11 = sphi %s884_s11, %s13_s11   ;;  %s855_s10 = sphi %s882_s10, %s977_s10   ;;  %s851_s9 = sphi %s880_s9, %s976_s9  }
   0x3   : > { %p34_p0 = scmp.ge.s32.totalorder %s32_s13, 2  ;;  %p674_p1 = scmp.ge.s32.totalorder %s859_s11, 1 }
   0x4   : > { %p121_p2 = scmp.lt.s32.totalorder %s859_s11, 3  ;;  %p905_p4 = scmp.eq.s32.totalorder %s672_s12, 0 }
   0x5   : > { %s979_s13 = smov (%p34_p0, %s32_s13), 0  ;;  %s861_s16 = smov [#allocation3]  }
   0x6   : > { %p901_p3 = pnand %p674_p1, %p121_p2  ;;  %s139_s17 = sshll.u32 %s861_s16, 4  ;;  %s140_s17 = int_to_ptr.vmem [resolvable:$true] %s139_s17 }
   0x7   : > { %s972_s15 = scalar_select %p905_p4, 1, 0 }
   0x8   : > { %s971_s14 = scalar_select %p901_p3, 1, 0 }
   0x9   : > { %p743_p5 = pneg %p901_p3  ;;  %s805_s21 = scalar_lea.hbm %s966_s1, 2048 }
   0xa   : > { %p806_p7 = scmp.ne.s32.totalorder %s966_s1, %s805_s21  ;;  %p812_p11 = scmp.lt.u32.totalorder %s805_s21, %s966_s1 }
   0xb   : > { %p913_p6 = pnand %p905_p4, %p743_p5 }
   0xd   : > { %p807_p8 = pneg %p913_p6 }
   0xf   : > { %p808_p9 = pnand %p807_p8, %p806_p7 }
  0x11   : > { %p809_p10 = pneg %p808_p9 }
  0x13   : > { %p814_p12 = pnand %p812_p11, %p809_p10 }
  0x15   : > { %817 = shalt.err (!%p814_p12)
}
  0x16   : > { %s818_s26 = scalar_lea.vmem %s140_s17, 2048  ;;  %p826_p2 = scmp.lt.s32.totalorder %s140_s17, %s140_s17 }
  0x17   : > { %p819_p13 = scmp.ne.s32.totalorder %s140_s17, %s818_s26  ;;  %p827_p5 = scmp.lt.s32.totalorder %s818_s26, %s818_s26 }
  0x19   : > { %p821_p0 = pnand %p819_p13, %p807_p8  ;;  %p828_p4 = por %p827_p5, %p826_p2 }
  0x1b   : > { %p822_p1 = pneg %p821_p0 }
  0x1d   : > { %p829_p3 = pnand %p828_p4, %p822_p1 }
  0x1f   : > { %832 = shalt.err (!%p829_p3)
}
  0x20   : > { %s862_s27 = smov 128   ;;  %s863_s28 = smov 8  }
  0x21   : > { %746 = dma.hbm_to_vmem [thread:$0]  (!%p913_p6), %s966_s1, 2048, %s140_s17, [#allocation4], %s862_s27, %s862_s27, %s863_s28  }
  0x22   : > { %p974_p7 = scmp.ne.s32.totalorder %s971_s14, 0 }
  0x23   : > { %p975_p9 = scmp.ne.s32.totalorder (!%p974_p7), %s972_s15, 0 }
  0x24   : > { %167 = sbr.rel (%p974_p7) target bundleno = 304 (0x130), region = 28 }
  0x2b   : > { %846 = dma.done.wait (%p975_p9), [#allocation4], 2048  }
  0x2c   : > { %848 = vsyncadd (%p975_p9), [#allocation4], 4294965248  ;;  %v864_v0 = vmov 0   ;;  %s679_s3 = sshll.u32 %s851_s9, 3  ;;  %v777_v1 = vld [vmem:[#allocation3 + $0x4] ss:$8 sps:$4 sm:$0xff]  }
  0x2d   : > { %417 = vmatprep.mubr.bf16.mxu0 %v864_v0  ;;  %437 = vmatprep.mubr.bf16.mxu1 %v864_v0  ;;  %p198_p3 = scmp.lt.s32.totalorder %s679_s3, 15  ;;  %v779_v2 = vld [vmem:[#allocation3] ss:$8 sps:$4 sm:$0xff]   ;;  %v780_v3 = vld [vmem:[#allocation3 + $0x14] ss:$8 sps:$4 sm:$0xff]  }
  0x2e   : > { %385 = vmatprep.subr.bf16.mxu0 %v777_v1  ;;  %723 = vmatprep.subr.bf16.mxu1 %v777_v1  ;;  %v782_v4 = vld [vmem:[#allocation3 + $0x10] ss:$8 sps:$4 sm:$0xff]   ;;  %v783_v5 = vld [vmem:[#allocation3 + $0x24] ss:$8 sps:$4 sm:$0xff]   ;;  %v785_v6 = vld [vmem:[#allocation3 + $0x20] ss:$8 sps:$4 sm:$0xff]  }
  0x2f   : > { %s981_s3 = smov (!%p198_p3, %s679_s3), 15  ;;  %386 = vmatpush1.bf16.msra.mxu0 %v779_v2  ;;  %731 = vmatpush1.bf16.msra.mxu1 %v779_v2  ;;  %v786_v7 = vld [vmem:[#allocation3 + $0x34] ss:$8 sps:$4 sm:$0xff]   ;;  %v788_v8 = vld [vmem:[#allocation3 + $0x30] ss:$8 sps:$4 sm:$0xff]  }
  0x30   : > { %387 = vmatprep.subr.bf16.mxu0 %v780_v3  ;;  %724 = vmatprep.subr.bf16.mxu1 %v780_v3  ;;  %s680_s4 = sshll.u32 %s981_s3, 2  ;;  %v789_v9 = vld [vmem:[#allocation3 + $0x44] ss:$8 sps:$4 sm:$0xff]   ;;  %v791_v10 = vld [vmem:[#allocation3 + $0x40] ss:$8 sps:$4 sm:$0xff]   ;;  %s714_s8 = sshll.u32 %s981_s3, 3 }
  0x31   : > { %s946_s7 = scalar_lea.vmem %s965_s0, %s680_s4  ;;  %v792_v11 = vld [vmem:[#allocation3 + $0x54] ss:$8 sps:$4 sm:$0xff]   ;;  %v794_v12 = vld [vmem:[#allocation3 + $0x50] ss:$8 sps:$4 sm:$0xff]   ;;  %v795_v13 = vld [vmem:[#allocation3 + $0x64] ss:$8 sps:$4 sm:$0xff]   ;;  %s217_s14 = scalar_lea.vmem %s967_s2, %s714_s8 }
  0x32   : > { %v797_v14 = vld [vmem:[#allocation3 + $0x60] ss:$8 sps:$4 sm:$0xff]   ;;  %v798_v15 = vld [vmem:[#allocation3 + $0x74] ss:$8 sps:$4 sm:$0xff]   ;;  %v800_v16 = vld [vmem:[#allocation3 + $0x70] ss:$8 sps:$4 sm:$0xff]  }
  0x33   : > { %388 = vmatpush1.bf16.msra.mxu0 %v782_v4  ;;  %732 = vmatpush1.bf16.msra.mxu1 %v782_v4  ;;  %v801_v17 = vld [vmem:[%s946_s7] sm:$0xff]   ;;  %v802_v18 = vld [vmem:[%s946_s7 + $0x10] sm:$0xff]   ;;  %v803_v19 = vld [vmem:[%s946_s7 + $0x8] sm:$0xff]  }
  0x34   : > { %389 = vmatprep.subr.bf16.mxu0 %v783_v5  ;;  %725 = vmatprep.subr.bf16.mxu1 %v783_v5  ;;  %v804_v20 = vld [vmem:[%s946_s7 + $0x18] sm:$0xff]  }
  0x37   : > { %390 = vmatpush1.bf16.msra.mxu0 %v785_v6  ;;  %733 = vmatpush1.bf16.msra.mxu1 %v785_v6 }
  0x38   : > { %391 = vmatprep.subr.bf16.mxu0 %v786_v7  ;;  %726 = vmatprep.subr.bf16.mxu1 %v786_v7 }
  0x3b   : > { %392 = vmatpush1.bf16.msra.mxu0 %v788_v8  ;;  %734 = vmatpush1.bf16.msra.mxu1 %v788_v8 }
  0x3c   : > { %393 = vmatprep.subr.bf16.mxu0 %v789_v9  ;;  %727 = vmatprep.subr.bf16.mxu1 %v789_v9 }
  0x3f   : > { %394 = vmatpush1.bf16.msra.mxu0 %v791_v10  ;;  %735 = vmatpush1.bf16.msra.mxu1 %v791_v10 }
  0x40   : > { %395 = vmatprep.subr.bf16.mxu0 %v792_v11  ;;  %728 = vmatprep.subr.bf16.mxu1 %v792_v11 }
  0x43   : > { %396 = vmatpush1.bf16.msra.mxu0 %v794_v12  ;;  %736 = vmatpush1.bf16.msra.mxu1 %v794_v12 }
  0x44   : > { %397 = vmatprep.subr.bf16.mxu0 %v795_v13  ;;  %729 = vmatprep.subr.bf16.mxu1 %v795_v13 }
  0x47   : > { %398 = vmatpush1.bf16.msra.mxu0 %v797_v14  ;;  %737 = vmatpush1.bf16.msra.mxu1 %v797_v14 }
  0x48   : > { %399 = vmatprep.subr.bf16.mxu0 %v798_v15  ;;  %730 = vmatprep.subr.bf16.mxu1 %v798_v15 }
  0x4b   : > { %400 = vmatpush1.bf16.msra.mxu0 %v800_v16  ;;  %738 = vmatpush1.bf16.msra.mxu1 %v800_v16 }
  0x4e   : > { %418 = vmatmul.mubr.bf16.vlgmr.msra.gmra.mrb[0].mxu0 %v801_v17  ;;  %438 = vmatmul.mubr.bf16.vlgmr.msra.gmra.mrb[0].mxu1 %v802_v18 }
  0x4f   : > { %427 = vmatprep.mubr.bf16.mxu0 %v864_v0  ;;  %447 = vmatprep.mubr.bf16.mxu1 %v864_v0 }
  0x56   : > { %428 = vmatmul.mubr.bf16.gmra.mrb[4].mxu0 %v803_v19  ;;  %448 = vmatmul.mubr.bf16.gmra.mrb[4].mxu1 %v804_v20 }
 0x121   : > { %v419_v21 = vpop.f32.mrb[0].mxu0  ;;  %v439_v22 = vpop.f32.mrb[0].mxu1 }
 0x122   : > { %v421_v23 = vpop.f32.mrb[1].mxu0  ;;  %v441_v24 = vpop.f32.mrb[1].mxu1 }
 0x123   : > { %v715_v25 = vpack.c.bf16 %v421_v23, %v419_v21  ;;  %v719_v26 = vpack.c.bf16 %v441_v24, %v439_v22  ;;  %v423_v27 = vpop.f32.mrb[2].mxu0  ;;  %v443_v28 = vpop.f32.mrb[2].mxu1 }
 0x124   : > { %v425_v29 = vpop.f32.mrb[3].mxu0  ;;  %v445_v30 = vpop.f32.mrb[3].mxu1 }
 0x125   : > { %557 = vst [vmem:[%s217_s14] sm:$0xff] %v715_v25  ;;  %561 = vst [vmem:[%s217_s14 + $0x20] sm:$0xff] %v719_v26  ;;  %v716_v31 = vpack.c.bf16 %v425_v29, %v423_v27  ;;  %v720_v32 = vpack.c.bf16 %v445_v30, %v443_v28 }
 0x127   : > { %558 = vst [vmem:[%s217_s14 + $0x8] sm:$0xff] %v716_v31  ;;  %562 = vst [vmem:[%s217_s14 + $0x28] sm:$0xff] %v720_v32 }
 0x129   : > { %v429_v33 = vpop.f32.mrb[4].mxu0  ;;  %v449_v34 = vpop.f32.mrb[4].mxu1 }
 0x12a   : > { %v431_v35 = vpop.f32.mrb[5].mxu0  ;;  %v451_v36 = vpop.f32.mrb[5].mxu1 }
 0x12b   : > { %v717_v37 = vpack.c.bf16 %v431_v35, %v429_v33  ;;  %v721_v38 = vpack.c.bf16 %v451_v36, %v449_v34  ;;  %v433_v39 = vpop.f32.mrb[6].mxu0  ;;  %v453_v40 = vpop.f32.mrb[6].mxu1 }
 0x12c   : > { %v435_v41 = vpop.f32.mrb[7].mxu0  ;;  %v455_v42 = vpop.f32.mrb[7].mxu1 }
 0x12d   : > { %559 = vst [vmem:[%s217_s14 + $0x10] sm:$0xff] %v717_v37  ;;  %563 = vst [vmem:[%s217_s14 + $0x30] sm:$0xff] %v721_v38  ;;  %v718_v43 = vpack.c.bf16 %v435_v41, %v433_v39  ;;  %v722_v44 = vpack.c.bf16 %v455_v42, %v453_v40 }
 0x12f   : > { %560 = vst [vmem:[%s217_s14 + $0x18] sm:$0xff] %v718_v43  ;;  %564 = vst [vmem:[%s217_s14 + $0x38] sm:$0xff] %v722_v44 }
 0x130 PF: > { %s13_s11 = sadd.s32 1, %s859_s11   ;;  %s976_s9 = smov %s855_s10 }
 0x131   : > { %p10_p4 = scmp.ge.s32.totalorder %s13_s11, 4   ;;  %s977_s10 = smov %s979_s13 }
 0x133   :  { %12 = sbr.rel (!%p10_p4) target bundleno = 2 (0x2), region = 72 }
 0x13a   :  { %598 = vsyncpa [#allocation4], 1 }
 0x13b   :  { %600 = vsyncpa [#allocation4 + $0x1], 1 }

// kernel: sage_forward.9
= control target key start
LH: loop header
LB: loop body
LE: loop exit
PB: predicated region body
PF: predicated region fallthrough
CT: control target
= control target key end

     0   :  { %s846_s9 = smov 0   ;;  %s848_s10 = smov 0   ;;  %s937_s0 = inlined_call_operand.vmem [shape: bf16[128,128], index: 0, kind: input, shape index: {}]   ;;  %s938_s1 = inlined_call_operand.vmem [shape: bf16[128,256], index: 1, kind: input, shape index: {}]   ;;  %s939_s2 = inlined_call_operand.vmem [shape: bf16[128,256], index: 2, kind: output, shape index: {}]  }
   0x1   :  { %s850_s11 = smov 0  }
   0x2 LB: > { %s31_s12 = sadd.s32 1, %s824_s10  ;;  %p692_p0 = scmp.ge.s32.totalorder %s828_s11, 1  ;;  %s828_s11 = sphi %s850_s11, %s12_s11   ;;  %s824_s10 = sphi %s848_s10, %s941_s10   ;;  %s820_s9 = sphi %s846_s9, %s940_s9  }
   0x3   : > { %p33_p1 = scmp.ge.s32.totalorder %s31_s12, 2  ;;  %p158_p2 = scmp.lt.s32.totalorder %s828_s11, 3 }
   0x5   : > { %s943_s12 = smov (%p33_p1, %s31_s12), 0  ;;  %p159_p3 = pnand %p692_p0, %p158_p2 }
   0x6   : > { %v778_v0 = vld [vmem:[%s938_s1 + $0x4] ss:$8 sps:$4 sm:$0xff] (!%p159_p3)   ;;  %s693_s15 = sshll.u32 (!%p159_p3), %s820_s9, 3  ;;  %v780_v1 = vld [vmem:[%s938_s1] ss:$8 sps:$4 sm:$0xff] (!%p159_p3)   ;;  %v830_v2 = vmov (!%p159_p3), 0  }
   0x7   : > { %162 = sbr.rel (%p159_p3) target bundleno = 266 (0x10a), region = 28  ;;  %428 = vmatprep.mubr.bf16.mxu0 (!%p159_p3), %v830_v2  ;;  %448 = vmatprep.mubr.bf16.mxu1 (!%p159_p3), %v830_v2  ;;  %p199_p4 = scmp.lt.s32.totalorder (!%p159_p3), %s693_s15, 15  ;;  %v781_v3 = vld [vmem:[%s938_s1 + $0x14] ss:$8 sps:$4 sm:$0xff] (!%p159_p3)   ;;  %v783_v4 = vld [vmem:[%s938_s1 + $0x10] ss:$8 sps:$4 sm:$0xff] (!%p159_p3)  }
   0x8   : > { %396 = vmatprep.subr.bf16.mxu0 (!%p159_p3), %v778_v0  ;;  %737 = vmatprep.subr.bf16.mxu1 (!%p159_p3), %v778_v0  ;;  %v784_v5 = vld [vmem:[%s938_s1 + $0x24] ss:$8 sps:$4 sm:$0xff] (!%p159_p3)   ;;  %v786_v6 = vld [vmem:[%s938_s1 + $0x20] ss:$8 sps:$4 sm:$0xff] (!%p159_p3)   ;;  %v787_v7 = vld [vmem:[%s938_s1 + $0x34] ss:$8 sps:$4 sm:$0xff] (!%p159_p3)  }
   0x9   : > { %397 = vmatpush1.bf16.msra.mxu0 (!%p159_p3), %v780_v1  ;;  %745 = vmatpush1.bf16.msra.mxu1 (!%p159_p3), %v780_v1  ;;  %v789_v8 = vld [vmem:[%s938_s1 + $0x30] ss:$8 sps:$4 sm:$0xff] (!%p159_p3)   ;;  %v790_v9 = vld [vmem:[%s938_s1 + $0x44] ss:$8 sps:$4 sm:$0xff] (!%p159_p3)   ;;  %v792_v10 = vld [vmem:[%s938_s1 + $0x40] ss:$8 sps:$4 sm:$0xff] (!%p159_p3)  }
   0xa   : > { %398 = vmatprep.subr.bf16.mxu0 (!%p159_p3), %v781_v3  ;;  %738 = vmatprep.subr.bf16.mxu1 (!%p159_p3), %v781_v3  ;;  %v793_v11 = vld [vmem:[%s938_s1 + $0x54] ss:$8 sps:$4 sm:$0xff] (!%p159_p3)   ;;  %v795_v12 = vld [vmem:[%s938_s1 + $0x50] ss:$8 sps:$4 sm:$0xff] (!%p159_p3)   ;;  %v796_v13 = vld [vmem:[%s938_s1 + $0x64] ss:$8 sps:$4 sm:$0xff] (!%p159_p3)  }
   0xb   : > { %v798_v14 = vld [vmem:[%s938_s1 + $0x60] ss:$8 sps:$4 sm:$0xff] (!%p159_p3)   ;;  %v799_v15 = vld [vmem:[%s938_s1 + $0x74] ss:$8 sps:$4 sm:$0xff] (!%p159_p3)   ;;  %v801_v16 = vld [vmem:[%s938_s1 + $0x70] ss:$8 sps:$4 sm:$0xff] (!%p159_p3)  }
   0xd   : > { %399 = vmatpush1.bf16.msra.mxu0 (!%p159_p3), %v783_v4  ;;  %746 = vmatpush1.bf16.msra.mxu1 (!%p159_p3), %v783_v4 }
   0xe   : > { %s945_s15 = smov (!%p199_p4, %s693_s15), 15  ;;  %400 = vmatprep.subr.bf16.mxu0 %v784_v5  ;;  %739 = vmatprep.subr.bf16.mxu1 %v784_v5 }
   0xf   : > { %s694_s24 = sshll.u32 %s945_s15, 2  ;;  %s728_s26 = sshll.u32 %s945_s15, 3 }
  0x10   : > { %s891_s3 = scalar_lea.vmem %s937_s0, %s694_s24  ;;  %s228_s29 = scalar_lea.vmem %s939_s2, %s728_s26 }
  0x11   : > { %401 = vmatpush1.bf16.msra.mxu0 %v786_v6  ;;  %747 = vmatpush1.bf16.msra.mxu1 %v786_v6  ;;  %v802_v17 = vld [vmem:[%s891_s3] sm:$0xff]   ;;  %v803_v18 = vld [vmem:[%s891_s3 + $0x10] sm:$0xff]   ;;  %v804_v19 = vld [vmem:[%s891_s3 + $0x8] sm:$0xff]  }
  0x12   : > { %402 = vmatprep.subr.bf16.mxu0 %v787_v7  ;;  %740 = vmatprep.subr.bf16.mxu1 %v787_v7  ;;  %v805_v20 = vld [vmem:[%s891_s3 + $0x18] sm:$0xff]  }
  0x15   : > { %403 = vmatpush1.bf16.msra.mxu0 %v789_v8  ;;  %748 = vmatpush1.bf16.msra.mxu1 %v789_v8 }
  0x16   : > { %404 = vmatprep.subr.bf16.mxu0 %v790_v9  ;;  %741 = vmatprep.subr.bf16.mxu1 %v790_v9 }
  0x19   : > { %405 = vmatpush1.bf16.msra.mxu0 %v792_v10  ;;  %749 = vmatpush1.bf16.msra.mxu1 %v792_v10 }
  0x1a   : > { %406 = vmatprep.subr.bf16.mxu0 %v793_v11  ;;  %742 = vmatprep.subr.bf16.mxu1 %v793_v11 }
  0x1d   : > { %407 = vmatpush1.bf16.msra.mxu0 %v795_v12  ;;  %750 = vmatpush1.bf16.msra.mxu1 %v795_v12 }
  0x1e   : > { %408 = vmatprep.subr.bf16.mxu0 %v796_v13  ;;  %743 = vmatprep.subr.bf16.mxu1 %v796_v13 }
  0x21   : > { %409 = vmatpush1.bf16.msra.mxu0 %v798_v14  ;;  %751 = vmatpush1.bf16.msra.mxu1 %v798_v14 }
  0x22   : > { %410 = vmatprep.subr.bf16.mxu0 %v799_v15  ;;  %744 = vmatprep.subr.bf16.mxu1 %v799_v15 }
  0x25   : > { %411 = vmatpush1.bf16.msra.mxu0 %v801_v16  ;;  %752 = vmatpush1.bf16.msra.mxu1 %v801_v16 }
  0x28   : > { %429 = vmatmul.mubr.bf16.vlgmr.msra.gmra.mrb[0].mxu0 %v802_v17  ;;  %449 = vmatmul.mubr.bf16.vlgmr.msra.gmra.mrb[0].mxu1 %v803_v18 }
  0x29   : > { %438 = vmatprep.mubr.bf16.mxu0 %v830_v2  ;;  %458 = vmatprep.mubr.bf16.mxu1 %v830_v2 }
  0x30   : > { %439 = vmatmul.mubr.bf16.gmra.mrb[4].mxu0 %v804_v19  ;;  %459 = vmatmul.mubr.bf16.gmra.mrb[4].mxu1 %v805_v20 }
  0xfb   : > { %v430_v21 = vpop.f32.mrb[0].mxu0  ;;  %v450_v22 = vpop.f32.mrb[0].mxu1 }
  0xfc   : > { %v432_v23 = vpop.f32.mrb[1].mxu0  ;;  %v452_v24 = vpop.f32.mrb[1].mxu1 }
  0xfd   : > { %v729_v25 = vpack.c.bf16 %v432_v23, %v430_v21  ;;  %v733_v26 = vpack.c.bf16 %v452_v24, %v450_v22  ;;  %v434_v27 = vpop.f32.mrb[2].mxu0  ;;  %v454_v28 = vpop.f32.mrb[2].mxu1 }
  0xfe   : > { %v436_v29 = vpop.f32.mrb[3].mxu0  ;;  %v456_v30 = vpop.f32.mrb[3].mxu1 }
  0xff   : > { %568 = vst [vmem:[%s228_s29] sm:$0xff] %v729_v25  ;;  %572 = vst [vmem:[%s228_s29 + $0x20] sm:$0xff] %v733_v26  ;;  %v730_v31 = vpack.c.bf16 %v436_v29, %v434_v27  ;;  %v734_v32 = vpack.c.bf16 %v456_v30, %v454_v28 }
 0x101   : > { %569 = vst [vmem:[%s228_s29 + $0x8] sm:$0xff] %v730_v31  ;;  %573 = vst [vmem:[%s228_s29 + $0x28] sm:$0xff] %v734_v32 }
 0x103   : > { %v440_v33 = vpop.f32.mrb[4].mxu0  ;;  %v460_v34 = vpop.f32.mrb[4].mxu1 }
 0x104   : > { %v442_v35 = vpop.f32.mrb[5].mxu0  ;;  %v462_v36 = vpop.f32.mrb[5].mxu1 }
 0x105   : > { %v731_v37 = vpack.c.bf16 %v442_v35, %v440_v33  ;;  %v735_v38 = vpack.c.bf16 %v462_v36, %v460_v34  ;;  %v444_v39 = vpop.f32.mrb[6].mxu0  ;;  %v464_v40 = vpop.f32.mrb[6].mxu1 }
 0x106   : > { %v446_v41 = vpop.f32.mrb[7].mxu0  ;;  %v466_v42 = vpop.f32.mrb[7].mxu1 }
 0x107   : > { %570 = vst [vmem:[%s228_s29 + $0x10] sm:$0xff] %v731_v37  ;;  %574 = vst [vmem:[%s228_s29 + $0x30] sm:$0xff] %v735_v38  ;;  %v732_v43 = vpack.c.bf16 %v446_v41, %v444_v39  ;;  %v736_v44 = vpack.c.bf16 %v466_v42, %v464_v40 }
 0x109   : > { %571 = vst [vmem:[%s228_s29 + $0x18] sm:$0xff] %v732_v43  ;;  %575 = vst [vmem:[%s228_s29 + $0x38] sm:$0xff] %v736_v44 }
 0x10a PF: > { %s12_s11 = sadd.s32 1, %s828_s11   ;;  %s940_s9 = smov %s824_s10 }
 0x10b   : > { %p9_p5 = scmp.ge.s32.totalorder %s12_s11, 4   ;;  %s941_s10 = smov %s943_s12 }
 0x10d   :  { %11 = sbr.rel (!%p9_p5) target bundleno = 2 (0x2), region = 69 }

// kernel: sage_forward.12
= control target key start
LH: loop header
LB: loop body
LE: loop exit
PB: predicated region body
PF: predicated region fallthrough
CT: control target
= control target key end

     0   :  { %s1214_s15 = smov 0   ;;  %s1216_s16 = smov 0   ;;  %s1385_s0 = inlined_call_operand.vmem [shape: s8[128,128], index: 0, kind: input, shape index: {}]   ;;  %s1386_s1 = inlined_call_operand.vmem [shape: bf16[128,256], index: 1, kind: input, shape index: {}, may-alias: {1,2}]   ;;  %s1387_s2 = inlined_call_operand.vmem [shape: bf16[128,256], index: 2, kind: input, shape index: {}, may-alias: {1,2}]   ;;  %s1388_s3 = inlined_call_operand.vmem [shape: f32[1,128], index: 3, kind: input, shape index: {}]   ;;  %s1389_s4 = inlined_call_operand.vmem [shape: bf16[128,128], index: 4, kind: output, shape index: {}]  }
   0x1   :  { %s1218_s17 = smov 0   ;;  %s1220_s18 = smov 0  }
   0x2   :  { %s1222_s19 = smov 0  }
   0x3 LB: > { %s925_s20 = sadd.s32 4294967295, %s1185_s19   ;;  %s26_s21 = sadd.s32 1, %s1181_s18  ;;  %s1185_s19 = sphi %s1222_s19, %s14_s19   ;;  %s1181_s18 = sphi %s1220_s18, %s1395_s18   ;;  %s1177_s17 = sphi %s1218_s17, %s1394_s17   ;;  %s1173_s16 = sphi %s1216_s16, %s1393_s16   ;;  %s1169_s15 = sphi %s1214_s15, %s1392_s15  }
   0x4   : > { %p28_p0 = scmp.ge.s32.totalorder %s26_s21, 2  ;;  %s82_s22 = sadd.s32 1, %s1173_s16 }
   0x5   : > { %p89_p1 = scmp.ne.s32.totalorder %s1173_s16, %s1169_s15  ;;  %p90_p2 = scmp.eq.s32.totalorder %s1185_s19, 0 }
   0x6   : > { %s1397_s21 = smov (%p28_p0, %s26_s21), 0  ;;  %p927_p4 = scmp.ge.s32.totalorder %s1185_s19, 1 }
   0x7   : > { %p1247_p3 = por %p90_p2, %p89_p1  ;;  %s79_s24 = ssub.s32 %s1181_s18, %s1397_s21 }
   0x8   : > { %p153_p5 = scmp.lt.s32.totalorder %s1185_s19, 3  ;;  %p80_p6 = scmp.eq.s32.totalorder %s79_s24, 0 }
   0xa   : > { %p1255_p7 = pnand %p927_p4, %p153_p5 }
   0xb   : > { %s1260_s26 = scalar_select %p80_p6, %s1173_s16, %s82_s22  }
   0xc   : > { %157 = sbr.rel (%p1255_p7) target bundleno = 31 (0x1f), region = 12  ;;  %p928_p8 = scmp.ne.s32.totalorder (!%p1255_p7), %s925_s20, 0 }
  0x13   : > { %161 = sbr.rel (%p928_p8) target bundleno = 31 (0x1f), region = 16  ;;  %v929_v0 = vld [vmem:[%s1386_s1 + $0x4] sm:$0xf] (!%p928_p8)  ;;  %v930_v1 = vld [vmem:[%s1386_s1 + $0xc] sm:$0xf] (!%p928_p8) }
  0x14   : > { %v931_v2 = vld [vmem:[%s1386_s1 + $0x14] sm:$0xf] (!%p928_p8)  ;;  %179 = vst [vmem:[#allocation4] sm:$0xf] (!%p928_p8), %v929_v0  ;;  %181 = vst [vmem:[#allocation4 + $0x4] sm:$0xf] (!%p928_p8), %v930_v1 }
  0x15   : > { %183 = vst [vmem:[#allocation4 + $0x8] sm:$0xf] (!%p928_p8), %v931_v2  ;;  %v932_v3 = vld [vmem:[%s1386_s1 + $0x1c] sm:$0xf] (!%p928_p8)  ;;  %v933_v4 = vld [vmem:[%s1386_s1 + $0x24] sm:$0xf] (!%p928_p8) }
  0x16   : > { %v934_v5 = vld [vmem:[%s1386_s1 + $0x2c] sm:$0xf] (!%p928_p8)  ;;  %185 = vst [vmem:[#allocation4 + $0xc] sm:$0xf] (!%p928_p8), %v932_v3  ;;  %187 = vst [vmem:[#allocation4 + $0x10] sm:$0xf] (!%p928_p8), %v933_v4 }
  0x17   : > { %189 = vst [vmem:[#allocation4 + $0x14] sm:$0xf] (!%p928_p8), %v934_v5  ;;  %v935_v6 = vld [vmem:[%s1386_s1 + $0x34] sm:$0xf] (!%p928_p8)  ;;  %v936_v7 = vld [vmem:[%s1386_s1 + $0x3c] sm:$0xf] (!%p928_p8) }
  0x18   : > { %v937_v8 = vld [vmem:[%s1386_s1 + $0x44] sm:$0xf] (!%p928_p8)  ;;  %191 = vst [vmem:[#allocation4 + $0x18] sm:$0xf] (!%p928_p8), %v935_v6  ;;  %193 = vst [vmem:[#allocation4 + $0x1c] sm:$0xf] (!%p928_p8), %v936_v7 }
  0x19   : > { %195 = vst [vmem:[#allocation4 + $0x20] sm:$0xf] (!%p928_p8), %v937_v8  ;;  %v938_v9 = vld [vmem:[%s1386_s1 + $0x4c] sm:$0xf] (!%p928_p8)  ;;  %v939_v10 = vld [vmem:[%s1386_s1 + $0x54] sm:$0xf] (!%p928_p8) }
  0x1a   : > { %v940_v11 = vld [vmem:[%s1386_s1 + $0x5c] sm:$0xf]  ;;  %197 = vst [vmem:[#allocation4 + $0x24] sm:$0xf] %v938_v9  ;;  %199 = vst [vmem:[#allocation4 + $0x28] sm:$0xf] %v939_v10 }
  0x1b   : > { %201 = vst [vmem:[#allocation4 + $0x2c] sm:$0xf] %v940_v11  ;;  %v941_v12 = vld [vmem:[%s1386_s1 + $0x64] sm:$0xf]  ;;  %v942_v13 = vld [vmem:[%s1386_s1 + $0x6c] sm:$0xf] }
  0x1c   : > { %v943_v14 = vld [vmem:[%s1386_s1 + $0x74] sm:$0xf]  ;;  %203 = vst [vmem:[#allocation4 + $0x30] sm:$0xf] %v941_v12  ;;  %205 = vst [vmem:[#allocation4 + $0x34] sm:$0xf] %v942_v13 }
  0x1d   : > { %207 = vst [vmem:[#allocation4 + $0x38] sm:$0xf] %v943_v14  ;;  %v944_v15 = vld [vmem:[%s1386_s1 + $0x7c] sm:$0xf] }
  0x1e   : > { %209 = vst [vmem:[#allocation4 + $0x3c] sm:$0xf] %v944_v15 }
  0x1f PF: > { %p945_p9 = scmp.ge.s32.totalorder %s1185_s19, 2 }
  0x21   : > { %268 = sbr.rel (%p945_p9) target bundleno = 49 (0x31), region = 61 }
  0x28   : > { %283 = sbr.rel (!%p1247_p3) target bundleno = 49 (0x31), region = 69  ;;  %s285_s22 = sand.u32 (%p1247_p3), 1, %s1173_s16  }
  0x29   : > { %s976_s24 = sshll.u32 (%p1247_p3), %s1181_s18, 6  ;;  %s946_s27 = sshll.u32 (%p1247_p3), %s285_s22, 5 }
  0x2a   : > { %s291_s30 = scalar_lea.vmem (%p1247_p3), %s1387_s2, %s976_s24  ;;  %s287_s5 = scalar_lea.vmem (%p1247_p3), [#allocation5], %s946_s27 }
  0x2b   : > { %v307_v16 = vld [vmem:[%s291_s30] sm:$0xf] (%p1247_p3)  ;;  %v309_v17 = vld [vmem:[%s291_s30 + $0x8] sm:$0xf] (%p1247_p3)  ;;  %v311_v18 = vld [vmem:[%s291_s30 + $0x10] sm:$0xf] (%p1247_p3) }
  0x2c   : > { %308 = vst [vmem:[%s287_s5] sm:$0xf] (%p1247_p3), %v307_v16  ;;  %310 = vst [vmem:[%s287_s5 + $0x4] sm:$0xf] (%p1247_p3), %v309_v17  ;;  %v313_v19 = vld [vmem:[%s291_s30 + $0x18] sm:$0xf] (%p1247_p3) }
  0x2d   : > { %v315_v20 = vld [vmem:[%s291_s30 + $0x20] sm:$0xf] (%p1247_p3)  ;;  %312 = vst [vmem:[%s287_s5 + $0x8] sm:$0xf] (%p1247_p3), %v311_v18  ;;  %314 = vst [vmem:[%s287_s5 + $0xc] sm:$0xf] (%p1247_p3), %v313_v19 }
  0x2e   : > { %316 = vst [vmem:[%s287_s5 + $0x10] sm:$0xf] (%p1247_p3), %v315_v20  ;;  %v317_v21 = vld [vmem:[%s291_s30 + $0x28] sm:$0xf] (%p1247_p3)  ;;  %v319_v22 = vld [vmem:[%s291_s30 + $0x30] sm:$0xf] (%p1247_p3) }
  0x2f   : > { %v321_v23 = vld [vmem:[%s291_s30 + $0x38] sm:$0xf]  ;;  %318 = vst [vmem:[%s287_s5 + $0x14] sm:$0xf] %v317_v21  ;;  %320 = vst [vmem:[%s287_s5 + $0x18] sm:$0xf] %v319_v22 }
  0x30   : > { %322 = vst [vmem:[%s287_s5 + $0x1c] sm:$0xf] %v321_v23 }
  0x31 PF: > { %364 = sbr.rel (%p1255_p7) target bundleno = 394 (0x18a), region = 110  ;;  %s952_s23 = sshll.u32 (!%p1255_p7), %s1177_s17, 1  ;;  %v1123_v24 = vld [vmem:[#allocation4] sm:$0xff] (!%p1255_p7)   ;;  %v1124_v25 = vld [vmem:[#allocation4 + $0x8] sm:$0xff] (!%p1255_p7)   ;;  %vm432_vm0 = vcmask (!%p1255_p7), 7168   ;;  %v1125_v26 = vld [vmem:[#allocation4 + $0x10] sm:$0xff] (!%p1255_p7)  }
  0x32   : > { %p404_p10 = scmp.lt.s32.totalorder (!%p1255_p7), %s952_s23, 3  ;;  %1039 = vmatprep.subr.bf16.mxu0 (!%p1255_p7), %v1123_v24  ;;  %1063 = vmatprep.subr.bf16.mxu1 (!%p1255_p7), %v1123_v24  ;;  %v1187_v27 = vmov (!%p1255_p7), 0.0   ;;  %v1126_v34 = vld [vmem:[#allocation4 + $0x18] sm:$0xff] (!%p1255_p7)   ;;  %v1127_v43 = vld [vmem:[#allocation4 + $0x20] sm:$0xff] (!%p1255_p7)   ;;  %v1128_v48 = vld [vmem:[#allocation4 + $0x28] sm:$0xff] (!%p1255_p7)   ;;  %v1188_v55 = vmov (!%p1255_p7), 0  }
  0x33   : > { %1040 = vmatpush3.bf16.msra.mxu0 (!%p1255_p7), %v1123_v24  ;;  %1071 = vmatpush3.bf16.msra.mxu1 (!%p1255_p7), %v1123_v24  ;;  %433 = vst.msk [vmem:[#allocation3] sm:$0xff] (!%p1255_p7), %vm432_vm0, %v1187_v27  ;;  %434 = vst.msk [vmem:[#allocation3 + $0x8] sm:$0xff] (!%p1255_p7), %vm432_vm0, %v1187_v27  ;;  %v1129_v51 = vld [vmem:[#allocation4 + $0x30] sm:$0xff] (!%p1255_p7)   ;;  %v1130_v52 = vld [vmem:[#allocation4 + $0x38] sm:$0xff] (!%p1255_p7)   ;;  %s370_s9 = sand.u32 (!%p1255_p7), 1, %s1169_s15   ;;  %s954_s11 = sshll.u32 (!%p1255_p7), %s1177_s17, 3 }
  0x34   : > { %1041 = vmatprep.subr.bf16.mxu0 (!%p1255_p7), %v1124_v25  ;;  %1064 = vmatprep.subr.bf16.mxu1 (!%p1255_p7), %v1124_v25  ;;  %435 = vst.msk [vmem:[#allocation3 + $0x10] sm:$0xff] (!%p1255_p7), %vm432_vm0, %v1187_v27  ;;  %436 = vst.msk [vmem:[#allocation3 + $0x18] sm:$0xff] (!%p1255_p7), %vm432_vm0, %v1187_v27  ;;  %s951_s10 = sshll.u32 (!%p1255_p7), %s370_s9, 5  ;;  %p414_p11 = scmp.lt.s32.totalorder (!%p1255_p7), %s954_s11, 15 }
  0x35   : > { %437 = vst.msk [vmem:[#allocation3 + $0x20] sm:$0xff] (!%p1255_p7), %vm432_vm0, %v1187_v27  ;;  %438 = vst.msk [vmem:[#allocation3 + $0x28] sm:$0xff] (!%p1255_p7), %vm432_vm0, %v1187_v27  ;;  %1121 = vset.pattern.permute.xlu0 (!%p1255_p7), %v1188_v55  ;;  %1122 = vset.pattern.permute.xlu1 (!%p1255_p7), %v1188_v55  ;;  %s1352_s12 = scalar_lea.vmem (!%p1255_p7), [#allocation5], %s951_s10 }
  0x36   : > { %439 = vst.msk [vmem:[#allocation3 + $0x30] sm:$0xff] (!%p1255_p7), %vm432_vm0, %v1187_v27  ;;  %440 = vst.msk [vmem:[#allocation3 + $0x38] sm:$0xff] (!%p1255_p7), %vm432_vm0, %v1187_v27 }
  0x37   : > { %1042 = vmatpush3.bf16.msra.mxu0 (!%p1255_p7), %v1124_v25  ;;  %1072 = vmatpush3.bf16.msra.mxu1 (!%p1255_p7), %v1124_v25 }
  0x38   : > { %s1399_s23 = smov (!%p404_p10, %s952_s23), 3  ;;  %1043 = vmatprep.subr.bf16.mxu0 %v1125_v26  ;;  %1065 = vmatprep.subr.bf16.mxu1 %v1125_v26  ;;  %s1401_s11 = smov (!%p414_p11, %s954_s11), 15 }
  0x39   : > { %s953_s6 = sshll.u32 %s1399_s23, 3  ;;  %s955_s15 = sshll.u32 %s1401_s11, 2 }
  0x3a   : > { %s410_s8 = scalar_lea.vmem %s1385_s0, %s953_s6  ;;  %v621_v56 = vld [vmem:[#allocation3] sm:$0xff]  ;;  %v622_v62 = vld [vmem:[#allocation3 + $0x8] sm:$0xff]  ;;  %s1362_s22 = scalar_lea.vmem %s1389_s4, %s955_s15 }
  0x3b   : > { %v1334_v28 = vld [vmem:[%s410_s8] sm:$0xff]  ;;  %v442_v33 = vld [vmem:[%s410_s8 + $0x8] sm:$0xff]  ;;  %1044 = vmatpush3.bf16.msra.mxu0 %v1125_v26  ;;  %1073 = vmatpush3.bf16.msra.mxu1 %v1125_v26  ;;  %v623_v57 = vld [vmem:[#allocation3 + $0x10] sm:$0xff] }
  0x3c   : > { %v443_v29 = vunpack.c.0.s8 %v1334_v28  ;;  %v444_v30 = vunpack.c.1.s8 %v1334_v28  ;;  %v445_v31 = vunpack.c.2.s8 %v1334_v28  ;;  %v446_v32 = vunpack.c.3.s8 %v1334_v28  ;;  %1045 = vmatprep.subr.bf16.mxu0 %v1126_v34  ;;  %1066 = vmatprep.subr.bf16.mxu1 %v1126_v34  ;;  %v624_v63 = vld [vmem:[#allocation3 + $0x18] sm:$0xff]  ;;  %v625_v4 = vld [vmem:[#allocation3 + $0x20] sm:$0xff]  ;;  %v626_v5 = vld [vmem:[#allocation3 + $0x28] sm:$0xff] }
  0x3d   : > { %v447_v37 = vunpack.c.0.s8 %v442_v33  ;;  %v448_v38 = vunpack.c.1.s8 %v442_v33  ;;  %v488_v41 = vunpack.c.l.s8.bf16 %v1334_v28  ;;  %v490_v42 = vunpack.c.l.s8.bf16 %v442_v33  ;;  %v627_v11 = vld [vmem:[#allocation3 + $0x30] sm:$0xff]  ;;  %v628_v12 = vld [vmem:[#allocation3 + $0x38] sm:$0xff] }
  0x3e   : > { %v451_v35 = vcvt.s32.f32 %v443_v29  ;;  %v453_v36 = vcvt.s32.f32 %v445_v31  ;;  %v452_v39 = vcvt.s32.f32 %v444_v30  ;;  %v454_v40 = vcvt.s32.f32 %v446_v32 }
  0x3f   : > { %1055 = vmatprep.mubr.bf16.mxu0 %v488_v41  ;;  %1059 = vmatprep.mubr.bf16.mxu1 %v490_v42  ;;  %v455_v44 = vcvt.s32.f32 %v447_v37  ;;  %v456_v45 = vcvt.s32.f32 %v448_v38  ;;  %v449_v46 = vunpack.c.2.s8 %v442_v33  ;;  %v450_v47 = vunpack.c.3.s8 %v442_v33 }
  0x40   : > { %629 = vadd.xlane.f32.xlu0 %v451_v35  ;;  %633 = vadd.xlane.f32.xlu1 %v453_v36  ;;  %v489_v53 = vunpack.c.h.s8.bf16 %v1334_v28  ;;  %v491_v54 = vunpack.c.h.s8.bf16 %v442_v33 }
  0x41   : > { %1046 = vmatpush3.bf16.msra.mxu0 %v1126_v34  ;;  %1074 = vmatpush3.bf16.msra.mxu1 %v1126_v34  ;;  %v457_v49 = vcvt.s32.f32 %v449_v46  ;;  %v458_v50 = vcvt.s32.f32 %v450_v47 }
  0x42   : > { %1047 = vmatprep.subr.bf16.mxu0 %v1127_v43  ;;  %1067 = vmatprep.subr.bf16.mxu1 %v1127_v43 }
  0x44   : > { %631 = vadd.xlane.f32.xlu0 %v452_v39  ;;  %635 = vadd.xlane.f32.xlu1 %v454_v40 }
  0x45   : > { %1048 = vmatpush3.bf16.msra.mxu0 %v1127_v43  ;;  %1075 = vmatpush3.bf16.msra.mxu1 %v1127_v43 }
  0x46   : > { %1049 = vmatprep.subr.bf16.mxu0 %v1128_v48  ;;  %1068 = vmatprep.subr.bf16.mxu1 %v1128_v48 }
  0x48   : > { %637 = vadd.xlane.f32.xlu0 %v455_v44  ;;  %639 = vadd.xlane.f32.xlu1 %v456_v45 }
  0x49   : > { %1050 = vmatpush3.bf16.msra.mxu0 %v1128_v48  ;;  %1076 = vmatpush3.bf16.msra.mxu1 %v1128_v48  ;;  %v986_v48 = vld [vmem:[%s1352_s12] sm:$0xff]  }
  0x4a   : > { %1051 = vmatprep.subr.bf16.mxu0 %v1129_v51  ;;  %1069 = vmatprep.subr.bf16.mxu1 %v1129_v51 }
  0x4c   : > { %641 = vadd.xlane.f32.xlu0 %v457_v49  ;;  %643 = vadd.xlane.f32.xlu1 %v458_v50 }
  0x4d   : > { %1052 = vmatpush3.bf16.msra.mxu0 %v1129_v51  ;;  %1077 = vmatpush3.bf16.msra.mxu1 %v1129_v51  ;;  %v987_v51 = vunpack.c.l.bf16 %v986_v48 }
  0x4e   : > { %1053 = vmatprep.subr.bf16.mxu0 %v1130_v52  ;;  %1070 = vmatprep.subr.bf16.mxu1 %v1130_v52 }
  0x51   : > { %1054 = vmatpush3.bf16.msra.mxu0 %v1130_v52  ;;  %1078 = vmatpush3.bf16.msra.mxu1 %v1130_v52  ;;  %v988_v52 = vunpack.c.h.bf16 %v986_v48 }
  0x54   : > { %1056 = vmatmul.mubr.bf16.vlgmr.msra.gmra.mrb[0].mxu0 %v489_v53  ;;  %1060 = vmatmul.mubr.bf16.vlgmr.msra.gmra.mrb[0].mxu1 %v491_v54 }
  0xcd   : > { %v630_v58 = vpop.xlane.xlu0 %629  ;;  %v634_v59 = vpop.xlane.xlu1 %633 }
  0xce   : > { %v645_v60 = vadd.f32 %v630_v58, %v621_v56  ;;  %v647_v61 = vadd.f32 %v634_v59, %v623_v57  ;;  %v964_v56 = vld [vmem:[%s1388_s3] ss:$0 sm:$0xff]  ;;  %v1021_v57 = vld [vmem:[%s1352_s12 + $0x8] sm:$0xff]  }
  0xd0   : > { %654 = vst.msk [vmem:[#allocation3] sm:$0xff] %vm432_vm0, %v645_v60  ;;  %656 = vst.msk [vmem:[#allocation3 + $0x10] sm:$0xff] %vm432_vm0, %v647_v61 }
  0xd1   : > { %v632_v0 = vpop.xlane.xlu0 %631  ;;  %v636_v1 = vpop.xlane.xlu1 %635 }
  0xd2   : > { %v646_v2 = vadd.f32 %v632_v0, %v622_v62  ;;  %v648_v3 = vadd.f32 %v636_v1, %v624_v63  ;;  %v991_v63 = vunpack.c.l.bf16 %v1021_v57  ;;  %v992_v1 = vunpack.c.h.bf16 %v1021_v57 }
  0xd4   : > { %655 = vst.msk [vmem:[#allocation3 + $0x8] sm:$0xff] %vm432_vm0, %v646_v2  ;;  %657 = vst.msk [vmem:[#allocation3 + $0x18] sm:$0xff] %vm432_vm0, %v648_v3 }
  0xd5   : > { %v638_v6 = vpop.xlane.xlu0 %637  ;;  %v640_v7 = vpop.xlane.xlu1 %639 }
  0xd6   : > { %v649_v8 = vadd.f32 %v638_v6, %v625_v4  ;;  %v650_v9 = vadd.f32 %v640_v7, %v626_v5  ;;  %v1022_v5 = vld [vmem:[%s1352_s12 + $0x10] sm:$0xff]  }
  0xd7   : > { %v665_v10 = vld [vmem:[#allocation3] sm:$0xff]  ;;  %v667_v16 = vld [vmem:[#allocation3 + $0x10] sm:$0xff] }
  0xd8   : > { %658 = vst.msk [vmem:[#allocation3 + $0x20] sm:$0xff] %vm432_vm0, %v649_v8  ;;  %659 = vst.msk [vmem:[#allocation3 + $0x28] sm:$0xff] %vm432_vm0, %v650_v9  ;;  %v673_v13 = vmax.f32 %v665_v10, 1.0  ;;  %v675_v21 = vmax.f32 %v667_v16, 1.0 }
  0xd9   : > { %v642_v14 = vpop.xlane.xlu0 %641  ;;  %v644_v15 = vpop.xlane.xlu1 %643 }
  0xda   : > { %1131 = vrcp.f32 %v673_v13  ;;  %v651_v17 = vadd.f32 %v642_v14, %v627_v11  ;;  %v652_v18 = vadd.f32 %v644_v15, %v628_v12  ;;  %v995_v11 = vunpack.c.l.bf16 %v1022_v5 }
  0xdb   : > { %v666_v19 = vld [vmem:[#allocation3 + $0x8] sm:$0xff]  ;;  %v668_v22 = vld [vmem:[#allocation3 + $0x18] sm:$0xff]  ;;  %v996_v13 = vunpack.c.h.bf16 %v1022_v5 }
  0xdc   : > { %660 = vst.msk [vmem:[#allocation3 + $0x30] sm:$0xff] %vm432_vm0, %v651_v17  ;;  %661 = vst.msk [vmem:[#allocation3 + $0x38] sm:$0xff] %vm432_vm0, %v652_v18  ;;  %v674_v20 = vmax.f32 %v666_v19, 1.0  ;;  %v676_v23 = vmax.f32 %v668_v22, 1.0  ;;  %v1023_v17 = vld [vmem:[%s1352_s12 + $0x18] sm:$0xff]  }
  0xde   : > { %1133 = vrcp.f32 %v674_v20 }
  0xdf   : > { %1135 = vrcp.f32 %v675_v21  ;;  %v669_v24 = vld [vmem:[#allocation3 + $0x20] sm:$0xff]  ;;  %v670_v27 = vld [vmem:[#allocation3 + $0x28] sm:$0xff] }
  0xe0   : > { %1137 = vrcp.f32 %v676_v23  ;;  %v677_v26 = vmax.f32 %v669_v24, 1.0  ;;  %v678_v29 = vmax.f32 %v670_v27, 1.0  ;;  %v999_v23 = vunpack.c.l.bf16 %v1023_v17 }
  0xe2   : > { %1139 = vrcp.f32 %v677_v26 }
  0xe3   : > { %v671_v30 = vld [vmem:[#allocation3 + $0x30] sm:$0xff]  ;;  %1141 = vrcp.f32 %v678_v29  ;;  %v672_v33 = vld [vmem:[#allocation3 + $0x38] sm:$0xff] }
  0xe4   : > { %v1132_v25 = vpop.eup %1131  ;;  %v679_v32 = vmax.f32 %v671_v30, 1.0  ;;  %v680_v35 = vmax.f32 %v672_v33, 1.0 }
  0xe5   : > { %699 = vperm.xlu0 %1121, %v1132_v25   ;;  %v1000_v25 = vunpack.c.h.bf16 %v1023_v17 }
  0xe6   : > { %1143 = vrcp.f32 %v679_v32 }
  0xe7   : > { %1145 = vrcp.f32 %v680_v35 }
  0xe8   : > { %v1134_v28 = vpop.eup %1133 }
  0xe9   : > { %704 = vperm.xlu1 %1122, %v1134_v28   ;;  %v1136_v31 = vpop.eup %1135 }
  0xea   : > { %v1138_v34 = vpop.eup %1137 }
  0xec   : > { %v1140_v36 = vpop.eup %1139 }
  0xed   : > { %709 = vperm.xlu1 %1122, %v1136_v31   ;;  %v1142_v37 = vpop.eup %1141 }
  0xf0   : > { %v1144_v38 = vpop.eup %1143 }
  0xf1   : > { %714 = vperm.xlu1 %1122, %v1138_v34   ;;  %v1146_v39 = vpop.eup %1145 }
  0xf5   : > { %719 = vperm.xlu1 %1122, %v1140_v36  }
  0xf9   : > { %724 = vperm.xlu1 %1122, %v1142_v37  }
  0xfd   : > { %729 = vperm.xlu1 %1122, %v1144_v38  }
 0x101   : > { %734 = vperm.xlu1 %1122, %v1146_v39  }
 0x127   : > { %v1057_v40 = vpop.f32.mrb[0].mxu0  ;;  %v1061_v41 = vpop.f32.mrb[0].mxu1 }
 0x128   : > { %v574_v42 = vpop.f32.mrb[1].mxu0  ;;  %v590_v43 = vpop.f32.mrb[1].mxu1 }
 0x129   : > { %v1058_v44 = vpop.f32.mrb[2].mxu0  ;;  %v1062_v45 = vpop.f32.mrb[2].mxu1 }
 0x12a   : > { %v577_v46 = vpop.f32.mrb[3].mxu0  ;;  %v593_v47 = vpop.f32.mrb[3].mxu1 }
 0x164   : > { %v700_v49 = vpop.permute.xlu0 %699 }
 0x165   : > { %v737_v50 = vmul.f32 %v700_v49, %v574_v42 }
 0x167   : > { %v761_v54 = vadd.f32 %v987_v51, %v737_v50 }
 0x168   : > { %v705_v53 = vpop.permute.xlu1 %704 }
 0x169   : > { %v738_v55 = vmul.f32 %v705_v53, %v577_v46  ;;  %v776_v60 = vadd.f32 %v964_v56, %v761_v54 }
 0x16b   : > { %v762_v58 = vadd.f32 %v988_v52, %v738_v55 }
 0x16c   : > { %v710_v59 = vpop.permute.xlu1 %709 }
 0x16d   : > { %v777_v61 = vadd.f32 %v964_v56, %v762_v58  ;;  %v739_v62 = vmul.f32 %v1057_v40, %v710_v59 }
 0x16f   : > { %v1004_v0 = vpack.c.bf16 %v777_v61, %v776_v60  ;;  %v763_v3 = vadd.f32 %v991_v63, %v739_v62 }
 0x170   : > { %v715_v2 = vpop.permute.xlu1 %714 }
 0x171   : > { %1005 = vst [vmem:[%s1362_s22] sm:$0xff] %v1004_v0   ;;  %v740_v4 = vmul.f32 %v1058_v44, %v715_v2  ;;  %v778_v8 = vadd.f32 %v964_v56, %v763_v3 }
 0x173   : > { %v764_v6 = vadd.f32 %v992_v1, %v740_v4 }
 0x174   : > { %v720_v7 = vpop.permute.xlu1 %719 }
 0x175   : > { %v779_v9 = vadd.f32 %v964_v56, %v764_v6  ;;  %v741_v10 = vmul.f32 %v720_v7, %v590_v43 }
 0x177   : > { %v1009_v12 = vpack.c.bf16 %v779_v9, %v778_v8  ;;  %v765_v15 = vadd.f32 %v995_v11, %v741_v10 }
 0x178   : > { %v725_v14 = vpop.permute.xlu1 %724 }
 0x179   : > { %1024 = vst [vmem:[%s1362_s22 + $0x8] sm:$0xff] %v1009_v12   ;;  %v742_v16 = vmul.f32 %v725_v14, %v593_v47  ;;  %v780_v20 = vadd.f32 %v964_v56, %v765_v15 }
 0x17b   : > { %v766_v18 = vadd.f32 %v996_v13, %v742_v16 }
 0x17c   : > { %v730_v19 = vpop.permute.xlu1 %729 }
 0x17d   : > { %v781_v21 = vadd.f32 %v964_v56, %v766_v18  ;;  %v743_v22 = vmul.f32 %v1061_v41, %v730_v19 }
 0x17f   : > { %v1014_v24 = vpack.c.bf16 %v781_v21, %v780_v20  ;;  %v767_v27 = vadd.f32 %v999_v23, %v743_v22 }
 0x180   : > { %v735_v26 = vpop.permute.xlu1 %734 }
 0x181   : > { %1025 = vst [vmem:[%s1362_s22 + $0x10] sm:$0xff] %v1014_v24   ;;  %v744_v28 = vmul.f32 %v1062_v45, %v735_v26  ;;  %v782_v30 = vadd.f32 %v964_v56, %v767_v27 }
 0x183   : > { %v768_v29 = vadd.f32 %v1000_v25, %v744_v28 }
 0x185   : > { %v783_v31 = vadd.f32 %v964_v56, %v768_v29 }
 0x187   : > { %v1019_v32 = vpack.c.bf16 %v783_v31, %v782_v30 }
 0x189   : > { %1026 = vst [vmem:[%s1362_s22 + $0x18] sm:$0xff] %v1019_v32  }
 0x18a PF: > { %s14_s19 = sadd.s32 1, %s1185_s19   ;;  %s1392_s15 = smov %s1173_s16 }
 0x18b   : > { %p11_p12 = scmp.ge.s32.totalorder %s14_s19, 4   ;;  %s1393_s16 = smov %s1260_s26 }
 0x18c   : > { %s1394_s17 = smov %s1181_s18  ;;  %s1395_s18 = smov %s1397_s21 }
 0x18d   :  { %13 = sbr.rel (!%p11_p12) target bundleno = 3 (0x3), region = 170 }

// kernel: sage_forward.13
= control target key start
LH: loop header
LB: loop body
LE: loop exit
PB: predicated region body
PF: predicated region fallthrough
CT: control target
= control target key end

     0   :  { %s986_s29 = smov 0   ;;  %s1095_s0 = inlined_call_operand.vmem [shape: bf16[128,128], index: 0, kind: input, shape index: {}]   ;;  %s1096_s1 = inlined_call_operand.vmem [shape: bf16[128,128], index: 1, kind: input, shape index: {}]   ;;  %s1097_s2 = inlined_call_operand.vmem [shape: bf16[128,128], index: 2, kind: input, shape index: {}]   ;;  %s1098_s3 = inlined_call_operand.vmem [shape: f32[1,128], index: 3, kind: input, shape index: {}]   ;;  %s1099_s4 = inlined_call_operand.vmem [shape: bf16[128,128], index: 4, kind: input, shape index: {}]   ;;  %s1100_s5 = inlined_call_operand.vmem [shape: f32[1,128], index: 5, kind: input, shape index: {}]   ;;  %s1101_s6 = inlined_call_operand.vmem [shape: f32[1,128], index: 6, kind: input, shape index: {}]   ;;  %s1102_s7 = inlined_call_operand.<no memory space> [shape: f32[1,1], index: 7, kind: input, shape index: {}]   ;;  %s1103_s8 = inlined_call_operand.vmem [shape: f32[128,1], index: 8, kind: output, shape index: {}]  }
   0x1   :  { %v13_v0 = vstv %s1102_s7 }
   0x2   :  { %14 = vst [vmem:[#allocation2] sm:$0x1] %v13_v0 }
   0x3 LB: > { %s797_s30 = sadd.s32 4294967295, %s936_s29   ;;  %p801_p0 = scmp.ge.s32.totalorder %s936_s29, 1  ;;  %s936_s29 = sphi %s986_s29, %s20_s29  }
   0x4   : > { %p276_p1 = scmp.lt.s32.totalorder %s936_s29, 3 }
   0x6   : > { %p277_p2 = pnand %p801_p0, %p276_p1 }
   0x7   : > { %v914_v1 = vld [vmem:[%s1097_s2] sm:$0xff] (!%p277_p2)   ;;  %s802_s7 = sshll.u32 (!%p277_p2), %s797_s30, 3  ;;  %v915_v2 = vld [vmem:[%s1097_s2 + $0x8] sm:$0xff] (!%p277_p2)   ;;  %v916_v3 = vld [vmem:[%s1097_s2 + $0x10] sm:$0xff] (!%p277_p2)   ;;  %vm720_vm0 = vcmask (!%p277_p2), 7168  }
   0x8   : > { %280 = sbr.rel (%p277_p2) target bundleno = 640 (0x280), region = 52  ;;  %p316_p3 = scmp.lt.s32.totalorder (!%p277_p2), %s802_s7, 15  ;;  %858 = vmatprep.subr.bf16.mxu0 (!%p277_p2), %v914_v1  ;;  %v917_v4 = vld [vmem:[%s1097_s2 + $0x18] sm:$0xff] (!%p277_p2)   ;;  %v918_v11 = vld [vmem:[%s1097_s2 + $0x20] sm:$0xff] (!%p277_p2)   ;;  %v923_v14 = vld [vmem:[%s1099_s4 + $0x8] sm:$0xff] (!%p277_p2)  }
   0x9   : > { %859 = vmatpush3.bf16.msra.mxu0 (!%p277_p2), %v914_v1  ;;  %v922_v13 = vld [vmem:[%s1099_s4] sm:$0xff] (!%p277_p2)   ;;  %v919_v15 = vld [vmem:[%s1097_s2 + $0x28] sm:$0xff] (!%p277_p2)   ;;  %v924_v16 = vld [vmem:[%s1099_s4 + $0x10] sm:$0xff] (!%p277_p2)  }
   0xa   : > { %860 = vmatprep.subr.bf16.mxu0 (!%p277_p2), %v915_v2  ;;  %882 = vmatprep.subr.bf16.mxu1 (!%p277_p2), %v922_v13  ;;  %v920_v17 = vld [vmem:[%s1097_s2 + $0x30] sm:$0xff] (!%p277_p2)   ;;  %v921_v18 = vld [vmem:[%s1097_s2 + $0x38] sm:$0xff] (!%p277_p2)   ;;  %v926_v30 = vld [vmem:[%s1099_s4 + $0x20] sm:$0xff] (!%p277_p2)  }
   0xb   : > { %883 = vmatpush3.bf16.msra.mxu1 (!%p277_p2), %v922_v13  ;;  %v925_v21 = vld [vmem:[%s1099_s4 + $0x18] sm:$0xff] (!%p277_p2)   ;;  %v927_v35 = vld [vmem:[%s1099_s4 + $0x28] sm:$0xff] (!%p277_p2)   ;;  %v928_v43 = vld [vmem:[%s1099_s4 + $0x30] sm:$0xff] (!%p277_p2)  }
   0xc   : > { %884 = vmatprep.subr.bf16.mxu1 (!%p277_p2), %v923_v14  ;;  %v929_v44 = vld [vmem:[%s1099_s4 + $0x38] sm:$0xff] (!%p277_p2)   ;;  %v808_v45 = vld [vmem:[%s1098_s3] ss:$0 sm:$0xff] (!%p277_p2) }
   0xd   : > { %861 = vmatpush3.bf16.msra.mxu0 (!%p277_p2), %v915_v2 }
   0xe   : > { %862 = vmatprep.subr.bf16.mxu0 (!%p277_p2), %v916_v3 }
   0xf   : > { %s1105_s7 = smov (!%p316_p3, %s802_s7), 15  ;;  %885 = vmatpush3.bf16.msra.mxu1 %v923_v14 }
  0x10   : > { %s803_s15 = sshll.u32 %s1105_s7, 2  ;;  %886 = vmatprep.subr.bf16.mxu1 %v924_v16  ;;  %s807_s12 = sshll.u32 %s1105_s7, 3 }
  0x11   : > { %s1009_s18 = scalar_lea.vmem %s1095_s0, %s803_s15  ;;  %s1014_s21 = scalar_lea.vmem %s1096_s1, %s803_s15  ;;  %863 = vmatpush3.bf16.msra.mxu0 %v916_v3 }
  0x12   : > { %v334_v5 = vld [vmem:[%s1009_s18] sm:$0xf]  ;;  %v335_v6 = vld [vmem:[%s1009_s18 + $0x4] sm:$0xf]  ;;  %864 = vmatprep.subr.bf16.mxu0 %v917_v4  ;;  %v336_v19 = vld [vmem:[%s1009_s18 + $0x8] sm:$0xf]  ;;  %s331_s15 = scalar_lea.vmem %s1103_s8, %s807_s12 }
  0x13   : > { %v342_v7 = vld [vmem:[%s1014_s21] sm:$0xf]  ;;  %v343_v8 = vld [vmem:[%s1014_s21 + $0x4] sm:$0xf]  ;;  %v337_v20 = vld [vmem:[%s1009_s18 + $0xc] sm:$0xf]  ;;  %887 = vmatpush3.bf16.msra.mxu1 %v924_v16 }
  0x14   : > { %v350_v9 = vmul.bf16 %v342_v7, %v334_v5  ;;  %v351_v10 = vmul.bf16 %v343_v8, %v335_v6  ;;  %v344_v22 = vld [vmem:[%s1014_s21 + $0x8] sm:$0xf]  ;;  %v345_v23 = vld [vmem:[%s1014_s21 + $0xc] sm:$0xf]  ;;  %v338_v24 = vld [vmem:[%s1009_s18 + $0x10] sm:$0xf]  ;;  %888 = vmatprep.subr.bf16.mxu1 %v925_v21 }
  0x15   : > { %865 = vmatpush3.bf16.msra.mxu0 %v917_v4  ;;  %v339_v25 = vld [vmem:[%s1009_s18 + $0x14] sm:$0xf]  ;;  %v346_v26 = vld [vmem:[%s1014_s21 + $0x10] sm:$0xf]  ;;  %v352_v28 = vmul.bf16 %v344_v22, %v336_v19  ;;  %v353_v29 = vmul.bf16 %v345_v23, %v337_v20  ;;  %v340_v34 = vld [vmem:[%s1009_s18 + $0x18] sm:$0xf] }
  0x16   : > { %v809_v12 = vcombine.low %v350_v9, %v351_v10  ;;  %866 = vmatprep.subr.bf16.mxu0 %v918_v11  ;;  %v347_v27 = vld [vmem:[%s1014_s21 + $0x14] sm:$0xf]  ;;  %v354_v31 = vmul.bf16 %v346_v26, %v338_v24  ;;  %v341_v37 = vld [vmem:[%s1009_s18 + $0x1c] sm:$0xf]  ;;  %v348_v38 = vld [vmem:[%s1014_s21 + $0x18] sm:$0xf] }
  0x17   : > { %v355_v32 = vmul.bf16 %v347_v27, %v339_v25  ;;  %889 = vmatpush3.bf16.msra.mxu1 %v925_v21  ;;  %v810_v33 = vcombine.low %v352_v28, %v353_v29  ;;  %v349_v39 = vld [vmem:[%s1014_s21 + $0x1c] sm:$0xf]  ;;  %v356_v40 = vmul.bf16 %v348_v38, %v340_v34  ;;  %v821_v10 = vld [vmem:[%s1100_s5] ss:$0 sm:$0xff] }
  0x18   : > { %874 = vmatprep.mubr.bf16.mxu0 %v809_v12  ;;  %890 = vmatprep.subr.bf16.mxu1 %v926_v30  ;;  %v357_v41 = vmul.bf16 %v349_v39, %v341_v37  ;;  %v830_v16 = vld [vmem:[%s1101_s6] ss:$0 sm:$0xff] }
  0x19   : > { %867 = vmatpush3.bf16.msra.mxu0 %v918_v11  ;;  %v811_v36 = vcombine.low %v354_v31, %v355_v32 }
  0x1a   : > { %868 = vmatprep.subr.bf16.mxu0 %v919_v15  ;;  %v812_v42 = vcombine.low %v356_v40, %v357_v41 }
  0x1b   : > { %891 = vmatpush3.bf16.msra.mxu1 %v926_v30 }
  0x1c   : > { %892 = vmatprep.subr.bf16.mxu1 %v927_v35 }
  0x1d   : > { %869 = vmatpush3.bf16.msra.mxu0 %v919_v15 }
  0x1e   : > { %870 = vmatprep.subr.bf16.mxu0 %v920_v17 }
  0x1f   : > { %893 = vmatpush3.bf16.msra.mxu1 %v927_v35 }
  0x20   : > { %894 = vmatprep.subr.bf16.mxu1 %v928_v43 }
  0x21   : > { %871 = vmatpush3.bf16.msra.mxu0 %v920_v17 }
  0x22   : > { %872 = vmatprep.subr.bf16.mxu0 %v921_v18 }
  0x23   : > { %895 = vmatpush3.bf16.msra.mxu1 %v928_v43 }
  0x24   : > { %896 = vmatprep.subr.bf16.mxu1 %v929_v44 }
  0x25   : > { %873 = vmatpush3.bf16.msra.mxu0 %v921_v18 }
  0x27   : > { %897 = vmatpush3.bf16.msra.mxu1 %v929_v44  ;;  %v831_v44 = vld [vmem:[#allocation2] ss:$0 sm:$0xff] }
  0x28   : > { %875 = vmatmul.mubr.bf16.vlgmr.msra.gmra.mrb[0].mxu0 %v810_v33 }
  0x29   : > { %878 = vmatprep.mubr.bf16.mxu0 %v811_v36 }
  0x30   : > { %879 = vmatmul.mubr.bf16.gmra.mrb[4].mxu0 %v812_v42 }
  0xfb   : > { %v876_v46 = vpop.f32.mrb[0].mxu0 }
  0xfc   : > { %v496_v47 = vadd.f32 %v876_v46, %v808_v45  ;;  %v487_v48 = vpop.f32.mrb[1].mxu0 }
  0xfd   : > { %v488_v49 = vadd.f32 %v808_v45, %v487_v48  ;;  %v877_v50 = vpop.f32.mrb[2].mxu0 }
  0xfe   : > { %v499_v51 = vadd.f32 %v877_v50, %v808_v45  ;;  %v490_v52 = vpop.f32.mrb[3].mxu0  ;;  %v520_v54 = vmax.f32 %v496_v47, 0.0 }
  0xff   : > { %v491_v53 = vadd.f32 %v808_v45, %v490_v52  ;;  %v518_v56 = vmax.f32 %v488_v49, 0.0 }
 0x100   : > { %v521_v55 = vmax.f32 %v499_v51, 0.0 }
 0x101   : > { %v519_v57 = vmax.f32 %v491_v53, 0.0 }
 0x102   : > { %v527_v58 = vpack.c.bf16 %v521_v55, %v520_v54 }
 0x103   : > { %v880_v59 = vpop.f32.mrb[4].mxu0  ;;  %v526_v60 = vpack.c.bf16 %v519_v57, %v518_v56 }
 0x104   : > { %v512_v61 = vadd.f32 %v880_v59, %v808_v45  ;;  %v503_v62 = vpop.f32.mrb[5].mxu0 }
 0x105   : > { %v504_v63 = vadd.f32 %v808_v45, %v503_v62  ;;  %v881_v0 = vpop.f32.mrb[6].mxu0  ;;  %898 = vmatprep.mubr.bf16.mxu1 %v526_v60 }
 0x106   : > { %v515_v1 = vadd.f32 %v881_v0, %v808_v45  ;;  %v506_v2 = vpop.f32.mrb[7].mxu0  ;;  %899 = vmatmul.mubr.bf16.vlgmr.msra.gmra.mrb[0].mxu1 %v527_v58  ;;  %v524_v4 = vmax.f32 %v512_v61, 0.0 }
 0x107   : > { %v507_v3 = vadd.f32 %v808_v45, %v506_v2  ;;  %v522_v6 = vmax.f32 %v504_v63, 0.0 }
 0x108   : > { %v525_v5 = vmax.f32 %v515_v1, 0.0 }
 0x109   : > { %v523_v7 = vmax.f32 %v507_v3, 0.0 }
 0x10a   : > { %v529_v8 = vpack.c.bf16 %v525_v5, %v524_v4 }
 0x10b   : > { %v528_v9 = vpack.c.bf16 %v523_v7, %v522_v6 }
 0x10d   : > { %902 = vmatprep.mubr.bf16.mxu1 %v528_v9 }
 0x10e   : > { %903 = vmatmul.mubr.bf16.gmra.mrb[4].mxu1 %v529_v8 }
 0x1d9   : > { %v900_v11 = vpop.f32.mrb[0].mxu1 }
 0x1da   : > { %v644_v12 = vadd.f32 %v900_v11, %v821_v10  ;;  %v635_v13 = vpop.f32.mrb[1].mxu1 }
 0x1db   : > { %v636_v14 = vadd.f32 %v821_v10, %v635_v13  ;;  %v901_v15 = vpop.f32.mrb[2].mxu1 }
 0x1dc   : > { %v668_v17 = vmax.f32 %v644_v12, 0.0  ;;  %v647_v18 = vadd.f32 %v901_v15, %v821_v10  ;;  %v638_v19 = vpop.f32.mrb[3].mxu1 }
 0x1dd   : > { %v666_v20 = vmax.f32 %v636_v14, 0.0  ;;  %v639_v21 = vadd.f32 %v821_v10, %v638_v19 }
 0x1de   : > { %v669_v22 = vmax.f32 %v647_v18, 0.0  ;;  %v683_v23 = vmul.f32 %v830_v16, %v668_v17 }
 0x1df   : > { %v667_v24 = vmax.f32 %v639_v21, 0.0  ;;  %v681_v25 = vmul.f32 %v830_v16, %v666_v20 }
 0x1e0   : > { %693 = vadd.xlane.f32.xlu1 %v683_v23  ;;  %v684_v28 = vmul.f32 %v830_v16, %v669_v22 }
 0x1e1   : > { %v904_v26 = vpop.f32.mrb[4].mxu1  ;;  %689 = vadd.xlane.f32.xlu0 %v681_v25  ;;  %v682_v32 = vmul.f32 %v830_v16, %v667_v24 }
 0x1e2   : > { %v651_v27 = vpop.f32.mrb[5].mxu1  ;;  %v660_v29 = vadd.f32 %v904_v26, %v821_v10 }
 0x1e3   : > { %v652_v30 = vadd.f32 %v821_v10, %v651_v27  ;;  %v905_v31 = vpop.f32.mrb[6].mxu1 }
 0x1e4   : > { %695 = vadd.xlane.f32.xlu1 %v684_v28  ;;  %v654_v33 = vpop.f32.mrb[7].mxu1  ;;  %v663_v35 = vadd.f32 %v905_v31, %v821_v10  ;;  %v672_v37 = vmax.f32 %v660_v29, 0.0 }
 0x1e5   : > { %v670_v34 = vmax.f32 %v652_v30, 0.0  ;;  %v655_v36 = vadd.f32 %v821_v10, %v654_v33  ;;  %691 = vadd.xlane.f32.xlu0 %v682_v32 }
 0x1e6   : > { %v673_v40 = vmax.f32 %v663_v35, 0.0  ;;  %v687_v42 = vmul.f32 %v830_v16, %v672_v37 }
 0x1e7   : > { %v671_v38 = vmax.f32 %v655_v36, 0.0  ;;  %v685_v39 = vmul.f32 %v830_v16, %v670_v34 }
 0x1e8   : > { %v688_v43 = vmul.f32 %v830_v16, %v673_v40 }
 0x1e9   : > { %697 = vadd.xlane.f32.xlu0 %v685_v39  ;;  %v686_v41 = vmul.f32 %v830_v16, %v671_v38 }
 0x1eb   : > { %699 = vadd.xlane.f32.xlu1 %v686_v41 }
 0x1ed   : > { %701 = vadd.xlane.f32.xlu0 %v687_v42 }
 0x1ef   : > { %703 = vadd.xlane.f32.xlu1 %v688_v43 }
 0x26d   : > { %v694_v45 = vpop.xlane.xlu1 %693 }
 0x26e   : > { %v714_v46 = vadd.f32 %v831_v44, %v694_v45  ;;  %v690_v47 = vpop.xlane.xlu0 %689 }
 0x26f   : > { %v712_v48 = vadd.f32 %v831_v44, %v690_v47 }
 0x270   : > { %723 = vst.msk [vmem:[%s331_s15 + $0x10] sm:$0xff] %vm720_vm0, %v714_v46 }
 0x271   : > { %721 = vst.msk [vmem:[%s331_s15] sm:$0xff] %vm720_vm0, %v712_v48  ;;  %v696_v49 = vpop.xlane.xlu1 %695 }
 0x272   : > { %v715_v50 = vadd.f32 %v831_v44, %v696_v49  ;;  %v692_v51 = vpop.xlane.xlu0 %691 }
 0x273   : > { %v713_v52 = vadd.f32 %v831_v44, %v692_v51 }
 0x274   : > { %724 = vst.msk [vmem:[%s331_s15 + $0x18] sm:$0xff] %vm720_vm0, %v715_v50 }
 0x275   : > { %722 = vst.msk [vmem:[%s331_s15 + $0x8] sm:$0xff] %vm720_vm0, %v713_v52 }
 0x276   : > { %v698_v53 = vpop.xlane.xlu0 %697 }
 0x277   : > { %v716_v54 = vadd.f32 %v831_v44, %v698_v53 }
 0x278   : > { %v700_v55 = vpop.xlane.xlu1 %699 }
 0x279   : > { %725 = vst.msk [vmem:[%s331_s15 + $0x20] sm:$0xff] %vm720_vm0, %v716_v54  ;;  %v717_v56 = vadd.f32 %v831_v44, %v700_v55 }
 0x27a   : > { %v702_v57 = vpop.xlane.xlu0 %701 }
 0x27b   : > { %726 = vst.msk [vmem:[%s331_s15 + $0x28] sm:$0xff] %vm720_vm0, %v717_v56  ;;  %v718_v58 = vadd.f32 %v831_v44, %v702_v57 }
 0x27c   : > { %v704_v59 = vpop.xlane.xlu1 %703 }
 0x27d   : > { %727 = vst.msk [vmem:[%s331_s15 + $0x30] sm:$0xff] %vm720_vm0, %v718_v58  ;;  %v719_v60 = vadd.f32 %v831_v44, %v704_v59 }
 0x27f   : > { %728 = vst.msk [vmem:[%s331_s15 + $0x38] sm:$0xff] %vm720_vm0, %v719_v60 }
 0x280 PF: > { %s20_s29 = sadd.s32 1, %s936_s29  }
 0x281   : > { %p17_p4 = scmp.ge.s32.totalorder %s20_s29, 4  }
 0x283   :  { %19 = sbr.rel (!%p17_p4) target bundleno = 3 (0x3), region = 85 }

</bundles_post_ra>
